<compile_context>
chip_gen: v6e
topology: v6e:2x2x1
jax: 0.10.0
libtpu: 0.0.40
codegen_flags: <defaults>
</compile_context>

<pallas_src>
import math

import jax
import jax.numpy as jnp
from jax.experimental import pallas as pl
from jax.experimental.pallas import tpu as pltpu


LANE = 128          # TPU lane width
TILE_B_MAX = 1024   # max batch rows per grid step


def _round_up(x, m):
    return ((x + m - 1) // m) * m


def actor_kernel(x_ref, w1_ref, b1_ref, w2_ref, b2_ref, w3_ref, b3_ref, o_ref):
    # x tile: [tile_b, state_dim] f32 -> bf16 MXU operands, f32 accumulation.
    x = x_ref[...].astype(jnp.bfloat16)

    # Layer 1: Linear + ReLU.  Cast the f32 accumulator once; bias/ReLU in bf16
    # (native on v6e/v7x VPU; widened automatically on v5e).
    h1 = jnp.dot(x, w1_ref[...], preferred_element_type=jnp.float32).astype(jnp.bfloat16)
    h1 = jnp.maximum(h1 + b1_ref[...], 0)

    # Layer 2: Linear + ReLU (same bf16 elementwise path).
    h2 = jnp.dot(h1, w2_ref[...], preferred_element_type=jnp.float32).astype(jnp.bfloat16)
    h2 = jnp.maximum(h2 + b2_ref[...], 0)

    # Layer 3: Linear + Tanh in f32 (EUP).  Output is lane-padded to 128 columns,
    # so the store is a full, unmasked vst.
    out = jnp.dot(h2, w3_ref[...], preferred_element_type=jnp.float32) + b3_ref[...]
    o_ref[...] = jnp.tanh(out)


def actor_forward(x, params, action_dim, *, tile_b=None):
    """x: [B, state_dim] f32; params: dict with w1,b1,w2,b2 (bf16), w3 (bf16, lane-padded),
    b3 (f32, lane-padded).  Returns [B, action_dim] f32."""
    w1, b1, w2, b2, w3, b3 = (params[k] for k in ("w1", "b1", "w2", "b2", "w3", "b3"))
    B, state_dim = x.shape
    h1_dim = w1.shape[1]
    h2_dim = w2.shape[1]
    out_pad = w3.shape[1]  # action_dim rounded up to a lane multiple (128)

    if tile_b is None:
        # Keep >= 2 grid steps when B >= 256 so v7x's two TensorCores both get work;
        # otherwise one tile covering the (rounded-up) batch.
        target = pl.cdiv(B, 2) if B >= 256 else B
        tile_b = min(TILE_B_MAX, _round_up(max(target, 1), LANE))

    num_tiles = pl.cdiv(B, tile_b)
    b_pad = num_tiles * tile_b
    if b_pad != B:
        # TODO(synk): for large batches in a tight RL loop, feed a batch that is already
        # a multiple of tile_b to avoid this extra HBM pad copy (and the slice below).
        x = jnp.pad(x, ((0, b_pad - B), (0, 0)))

    # Weights/biases: full-array blocks with constant index_map -> fetched once,
    # resident in VMEM across all grid steps.
    def resident(arr):
        return pl.BlockSpec(arr.shape, lambda i: (0, 0))

    weight_bytes = sum(a.size * a.dtype.itemsize for a in (w1, b1, w2, b2, w3, b3))
    cost = pl.CostEstimate(
        flops=2 * b_pad * (state_dim * h1_dim + h1_dim * h2_dim + h2_dim * out_pad),
        transcendentals=b_pad * out_pad,
        bytes_accessed=b_pad * state_dim * 4 + b_pad * out_pad * 4 + weight_bytes,
    )

    out = pl.pallas_call(
        actor_kernel,
        out_shape=jax.ShapeDtypeStruct((b_pad, out_pad), jnp.float32),
        grid=(num_tiles,),
        in_specs=[
            pl.BlockSpec((tile_b, state_dim), lambda i: (i, 0)),  # x: tiled over batch
            resident(w1), resident(b1),
            resident(w2), resident(b2),
            resident(w3), resident(b3),
        ],
        out_specs=pl.BlockSpec((tile_b, out_pad), lambda i: (i, 0)),
        compiler_params=pltpu.CompilerParams(
            dimension_semantics=("parallel",),  # shards batch across TCs on v7x
        ),
        cost_estimate=cost,
    )(x, w1, b1, w2, b2, w3, b3)

    return out[:B, :action_dim]


def init_params(key, state_dim=8, action_dim=2, hidden_dim=(400, 300)):
    """Deterministic init mimicking PyTorch nn.Linear default U(-1/sqrt(fan_in), +).

    Weights and layer-1/2 biases are stored in bf16 (MXU operands / bf16 VPU adds);
    the layer-3 bias stays f32.  w3/b3 are zero-padded to a 128-lane output."""
    h1, h2 = hidden_dim
    keys = jax.random.split(key, 6)

    def linear(kw, kb, fan_in, fan_out):
        bound = 1.0 / math.sqrt(fan_in)
        w = jax.random.uniform(kw, (fan_in, fan_out), jnp.float32, -bound, bound)
        b = jax.random.uniform(kb, (1, fan_out), jnp.float32, -bound, bound)
        return w, b

    w1, b1 = linear(keys[0], keys[1], state_dim, h1)
    w2, b2 = linear(keys[2], keys[3], h1, h2)
    w3, b3 = linear(keys[4], keys[5], h2, action_dim)

    out_pad = _round_up(action_dim, LANE)
    w3 = jnp.pad(w3, ((0, 0), (0, out_pad - action_dim)))
    b3 = jnp.pad(b3, ((0, 0), (0, out_pad - action_dim)))

    bf16 = jnp.bfloat16
    return dict(
        w1=w1.astype(bf16), b1=b1.astype(bf16),
        w2=w2.astype(bf16), b2=b2.astype(bf16),
        w3=w3.astype(bf16), b3=b3,  # b3 kept f32 for the f32 tanh path
    )


def actor_forward_ref(x, p, action_dim):
    """Pure-JAX reference mirroring the kernel's bf16-operand / f32-accumulate /
    bf16-elementwise math exactly."""
    bf16, f32 = jnp.bfloat16, jnp.float32
    h = x.astype(bf16)
    h = jnp.dot(h, p["w1"], preferred_element_type=f32).astype(bf16)
    h = jnp.maximum(h + p["b1"], 0)
    h = jnp.dot(h, p["w2"], preferred_element_type=f32).astype(bf16)
    h = jnp.maximum(h + p["b2"], 0)
    out = jnp.dot(h, p["w3"], preferred_element_type=f32) + p["b3"]
    return jnp.tanh(out)[:, :action_dim]


if __name__ == "__main__":
    key = jax.random.PRNGKey(0)
    k_params, k_x = jax.random.split(key)

    state_dim, action_dim, hidden_dim = 8, 2, (400, 300)
    batch = 2

    params = init_params(k_params, state_dim, action_dim, hidden_dim)
    x = jax.random.normal(k_x, (batch, state_dim), jnp.float32)

    out = actor_forward(x, params, action_dim)
    jax.block_until_ready(out)

    ref = actor_forward_ref(x, params, action_dim)
    assert out.shape == (batch, action_dim), out.shape
    # bf16 matmul operands + bf16 elementwise -> loosened tolerance vs. pure f32.
    assert jnp.allclose(out, ref, atol=2e-2, rtol=2e-2), (out, ref)

    print("KERNEL_OK")
</pallas_src>

<mosaic_0001>
module attributes {stable_mosaic.version = 11 : i64} {
  func.func @actor_kernel(%arg0: i32, %arg1: memref<128x8xf32, #tpu.memory_space<vmem>>, %arg2: memref<8x400xbf16, #tpu.memory_space<vmem>>, %arg3: memref<1x400xbf16, #tpu.memory_space<vmem>>, %arg4: memref<400x300xbf16, #tpu.memory_space<vmem>>, %arg5: memref<1x300xbf16, #tpu.memory_space<vmem>>, %arg6: memref<300x128xbf16, #tpu.memory_space<vmem>>, %arg7: memref<1x128xf32, #tpu.memory_space<vmem>>, %arg8: memref<128x128xf32, #tpu.memory_space<vmem>>) attributes {dimension_semantics = [#tpu.dimension_semantics<parallel>], iteration_bounds = array<i64: 1>, scalar_prefetch = 0 : i64, scratch_operands = 0 : i64, tpu.core_type = #tpu.core_type<tc>, window_params = [{transform_indices = @transform_0, window_bounds = array<i64: 128, 8>}, {pipeline_mode = #tpu.pipeline_mode<synchronous>, transform_indices = @transform_1, window_bounds = array<i64: 8, 400>}, {pipeline_mode = #tpu.pipeline_mode<synchronous>, transform_indices = @transform_2, window_bounds = array<i64: 1, 400>}, {pipeline_mode = #tpu.pipeline_mode<synchronous>, transform_indices = @transform_3, window_bounds = array<i64: 400, 300>}, {pipeline_mode = #tpu.pipeline_mode<synchronous>, transform_indices = @transform_4, window_bounds = array<i64: 1, 300>}, {pipeline_mode = #tpu.pipeline_mode<synchronous>, transform_indices = @transform_5, window_bounds = array<i64: 300, 128>}, {pipeline_mode = #tpu.pipeline_mode<synchronous>, transform_indices = @transform_6, window_bounds = array<i64: 1, 128>}, {transform_indices = @transform_7, window_bounds = array<i64: 128, 128>}]} {
    %c0 = arith.constant 0 : index
    %c0_0 = arith.constant 0 : index
    %0 = vector.load %arg1[%c0, %c0_0] : memref<128x8xf32, #tpu.memory_space<vmem>>, vector<128x8xf32>
    %1 = arith.truncf %0 : vector<128x8xf32> to vector<128x8xbf16>
    %c0_1 = arith.constant 0 : index
    %c0_2 = arith.constant 0 : index
    %2 = vector.load %arg2[%c0_1, %c0_2] : memref<8x400xbf16, #tpu.memory_space<vmem>>, vector<8x400xbf16>
    %cst = arith.constant dense<0.000000e+00> : vector<128x400xf32>
    %3 = tpu.matmul %1, %2, %cst {dimension_numbers = #tpu.dot_dimension_numbers<[1], [0], [0], [1], [0, 0, 1, 1], [], []>} : vector<128x8xbf16>, vector<8x400xbf16>, vector<128x400xf32> -> vector<128x400xf32>
    %4 = arith.truncf %3 : vector<128x400xf32> to vector<128x400xbf16>
    %c0_3 = arith.constant 0 : index
    %c0_4 = arith.constant 0 : index
    %5 = vector.load %arg3[%c0_3, %c0_4] : memref<1x400xbf16, #tpu.memory_space<vmem>>, vector<1x400xbf16>
    %6 = vector.broadcast %5 : vector<1x400xbf16> to vector<128x400xbf16>
    %7 = arith.addf %4, %6 : vector<128x400xbf16>
    %cst_5 = arith.constant 0.000000e+00 : bf16
    %8 = vector.broadcast %cst_5 : bf16 to vector<128x400xbf16>
    %9 = arith.maximumf %7, %8 : vector<128x400xbf16>
    %c0_6 = arith.constant 0 : index
    %c0_7 = arith.constant 0 : index
    %10 = vector.load %arg4[%c0_6, %c0_7] : memref<400x300xbf16, #tpu.memory_space<vmem>>, vector<400x300xbf16>
    %cst_8 = arith.constant dense<0.000000e+00> : vector<128x300xf32>
    %11 = tpu.matmul %9, %10, %cst_8 {dimension_numbers = #tpu.dot_dimension_numbers<[1], [0], [0], [1], [0, 0, 1, 1], [], []>} : vector<128x400xbf16>, vector<400x300xbf16>, vector<128x300xf32> -> vector<128x300xf32>
    %12 = arith.truncf %11 : vector<128x300xf32> to vector<128x300xbf16>
    %c0_9 = arith.constant 0 : index
    %c0_10 = arith.constant 0 : index
    %13 = vector.load %arg5[%c0_9, %c0_10] : memref<1x300xbf16, #tpu.memory_space<vmem>>, vector<1x300xbf16>
    %14 = vector.broadcast %13 : vector<1x300xbf16> to vector<128x300xbf16>
    %15 = arith.addf %12, %14 : vector<128x300xbf16>
    %cst_11 = arith.constant 0.000000e+00 : bf16
    %16 = vector.broadcast %cst_11 : bf16 to vector<128x300xbf16>
    %17 = arith.maximumf %15, %16 : vector<128x300xbf16>
    %c0_12 = arith.constant 0 : index
    %c0_13 = arith.constant 0 : index
    %18 = vector.load %arg6[%c0_12, %c0_13] : memref<300x128xbf16, #tpu.memory_space<vmem>>, vector<300x128xbf16>
    %cst_14 = arith.constant dense<0.000000e+00> : vector<128x128xf32>
    %19 = tpu.matmul %17, %18, %cst_14 {dimension_numbers = #tpu.dot_dimension_numbers<[1], [0], [0], [1], [0, 0, 1, 1], [], []>} : vector<128x300xbf16>, vector<300x128xbf16>, vector<128x128xf32> -> vector<128x128xf32>
    %c0_15 = arith.constant 0 : index
    %c0_16 = arith.constant 0 : index
    %20 = vector.load %arg7[%c0_15, %c0_16] : memref<1x128xf32, #tpu.memory_space<vmem>>, vector<1x128xf32>
    %21 = vector.broadcast %20 : vector<1x128xf32> to vector<128x128xf32>
    %22 = arith.addf %19, %21 : vector<128x128xf32>
    %23 = math.tanh %22 : vector<128x128xf32>
    %c0_17 = arith.constant 0 : index
    %c0_18 = arith.constant 0 : index
    %24 = vector.load %arg8[%c0_17, %c0_18] : memref<128x128xf32, #tpu.memory_space<vmem>>, vector<128x128xf32>
    tpu.vector_store %arg8[%c0_17, %c0_18], %23 {strides = array<i32>} : memref<128x128xf32, #tpu.memory_space<vmem>>, vector<128x128xf32>,
    return
  }
  func.func @transform_0(%arg0: i32) -> (i32, i32) {
    %c0_i32 = arith.constant 0 : i32
    %c0_i32_0 = arith.constant 0 : i32
    return %arg0, %c0_i32 : i32, i32
  }
  func.func @transform_1(%arg0: i32) -> (i32, i32) {
    %c0_i32 = arith.constant 0 : i32
    %c0_i32_0 = arith.constant 0 : i32
    %c0_i32_1 = arith.constant 0 : i32
    return %c0_i32, %c0_i32_0 : i32, i32
  }
  func.func @transform_2(%arg0: i32) -> (i32, i32) {
    %c0_i32 = arith.constant 0 : i32
    %c0_i32_0 = arith.constant 0 : i32
    %c0_i32_1 = arith.constant 0 : i32
    return %c0_i32, %c0_i32_0 : i32, i32
  }
  func.func @transform_3(%arg0: i32) -> (i32, i32) {
    %c0_i32 = arith.constant 0 : i32
    %c0_i32_0 = arith.constant 0 : i32
    %c0_i32_1 = arith.constant 0 : i32
    return %c0_i32, %c0_i32_0 : i32, i32
  }
  func.func @transform_4(%arg0: i32) -> (i32, i32) {
    %c0_i32 = arith.constant 0 : i32
    %c0_i32_0 = arith.constant 0 : i32
    %c0_i32_1 = arith.constant 0 : i32
    return %c0_i32, %c0_i32_0 : i32, i32
  }
  func.func @transform_5(%arg0: i32) -> (i32, i32) {
    %c0_i32 = arith.constant 0 : i32
    %c0_i32_0 = arith.constant 0 : i32
    %c0_i32_1 = arith.constant 0 : i32
    return %c0_i32, %c0_i32_0 : i32, i32
  }
  func.func @transform_6(%arg0: i32) -> (i32, i32) {
    %c0_i32 = arith.constant 0 : i32
    %c0_i32_0 = arith.constant 0 : i32
    %c0_i32_1 = arith.constant 0 : i32
    return %c0_i32, %c0_i32_0 : i32, i32
  }
  func.func @transform_7(%arg0: i32) -> (i32, i32) {
    %c0_i32 = arith.constant 0 : i32
    %c0_i32_0 = arith.constant 0 : i32
    return %arg0, %c0_i32 : i32, i32
  }
}

</mosaic_0001>

<bundles_post_ra>
// kernel: tpu_custom_call.1
= control target key start
LH: loop header
LB: loop body
LE: loop exit
PB: predicated region body
PF: predicated region fallthrough
CT: control target
= control target key end

     0   :  { %12 = vsyncpa [#allocation3], 0  ;;  %s3061_s0 = inlined_call_operand.vmem [shape: f32[128,8], index: 0, kind: input, shape index: {}]   ;;  %s3062_s1 = inlined_call_operand.vmem [shape: bf16[8,400], index: 1, kind: input, shape index: {}]   ;;  %s3063_s2 = inlined_call_operand.vmem [shape: bf16[1,400], index: 2, kind: input, shape index: {}]   ;;  %s3064_s3 = inlined_call_operand.hbm [shape: bf16[400,300], index: 3, kind: input, shape index: {}]   ;;  %s3065_s4 = inlined_call_operand.vmem [shape: bf16[1,300], index: 4, kind: input, shape index: {}]   ;;  %s3066_s5 = inlined_call_operand.hbm [shape: bf16[300,128], index: 5, kind: input, shape index: {}]   ;;  %s3067_s6 = inlined_call_operand.vmem [shape: f32[1,128], index: 6, kind: input, shape index: {}]   ;;  %s3068_s7 = inlined_call_operand.hbm [shape: f32[128,128], index: 7, kind: output, shape index: {}]  }
   0x1   :  { %13 = vsyncpa [#allocation6], 0 }
   0x2   :  { %14 = vsyncpa [#allocation4], 0  ;;  %s2553_s24 = smov [#allocation2]  }
   0x3   :  { %s26_s25 = sshll.u32 %s2553_s24, 4  ;;  %s27_s25 = int_to_ptr.vmem [resolvable:$true] %s26_s25 }
   0x4   :  { %s2495_s26 = scalar_lea.vmem %s27_s25, 9600  ;;  %p2500_p1 = scmp.lt.s32.totalorder %s27_s25, %s27_s25 }
   0x5   :  { %p2496_p0 = scmp.ne.s32.totalorder %s27_s25, %s2495_s26  ;;  %p2501_p2 = scmp.lt.s32.totalorder %s2495_s26, %s2495_s26 }
   0x7   :  { %p2502_p3 = por %p2501_p2, %p2500_p1 }
   0x9   :  { %p2503_p4 = pnand %p2502_p3, %p2496_p0 }
   0xb   :  { %2506 = shalt.err (!%p2503_p4)
}
   0xc   :  { %s2554_s27 = smov 192   ;;  %s2555_s28 = smov 12  }
   0xd   :  { %32 = dma.hbm_to_vmem [thread:$0]  %s3064_s3, 9600, %s27_s25, [#allocation3], %s2554_s27, %s2554_s27, %s2555_s28  }
   0xe   :  { %s2556_s8 = smov [#allocation5]  }
   0xf   :  { %s40_s9 = sshll.u32 %s2556_s8, 4  ;;  %s41_s9 = int_to_ptr.vmem [resolvable:$true] %s40_s9 }
  0x10   :  { %s2515_s10 = scalar_lea.vmem %s41_s9, 2432  ;;  %p2520_p6 = scmp.lt.s32.totalorder %s41_s9, %s41_s9 }
  0x11   :  { %p2516_p5 = scmp.ne.s32.totalorder %s41_s9, %s2515_s10  ;;  %p2521_p7 = scmp.lt.s32.totalorder %s2515_s10, %s2515_s10 }
  0x13   :  { %p2522_p8 = por %p2521_p7, %p2520_p6 }
  0x15   :  { %p2523_p9 = pnand %p2522_p8, %p2516_p5 }
  0x17   :  { %2526 = shalt.err (!%p2523_p9)
}
  0x18   :  { %s2557_s11 = smov 64   ;;  %s2558_s12 = smov 4  }
  0x19   :  { %46 = dma.hbm_to_vmem [thread:$0]  %s3066_s5, 2432, %s41_s9, [#allocation6], %s2557_s11, %s2557_s11, %s2558_s12  }
  0x1a   :  { %2547 = dma.done.wait [#allocation3], 9600  }
  0x1b   :  { %2548 = vsyncadd [#allocation3], 4294957696 }
  0x1c   :  { %2549 = dma.done.wait [#allocation6], 2432  }
  0x1d   :  { %2550 = vsyncadd [#allocation6], 4294964864  ;;  %v2559_v0 = vmov 0   ;;  %v80_v1 = vld [vmem:[%s3062_s1] sm:$0xff]  ;;  %vm117_vm0 = vcmask 1043456   ;;  %v81_v2 = vld [vmem:[%s3062_s1 + $0x8] sm:$0xff] }
  0x1e   :  { %162 = vmatprep.mubr.bf16.mxu0 %v2559_v0  ;;  %275 = vmatprep.mubr.bf16.mxu1 %v2559_v0  ;;  %v56_v3 = vld [vmem:[%s3061_s0] sm:$0xff]  ;;  %v2001_v4 = vcombine.high %v80_v1, %v80_v1  ;;  %v2003_v5 = vcombine.high %v81_v2, %v81_v2  ;;  %v2000_v6 = vcombine.low %v80_v1, %v80_v1  ;;  %v57_v8 = vld [vmem:[%s3061_s0 + $0x8] sm:$0xff]  ;;  %vm92_vm1 = vcmask 64512   ;;  %v58_v12 = vld [vmem:[%s3061_s0 + $0x10] sm:$0xff] }
  0x1f   :  { %v2002_v7 = vcombine.low %v81_v2, %v81_v2  ;;  %v72_v11 = vpack.c.bf16 %v57_v8, %v56_v3  ;;  %v2336_v13 = vld [vmem:[#allocation2 + $0xa8] ss:$12 sps:$4 sm:$0xff]   ;;  %v2338_v14 = vld [vmem:[#allocation2 + $0xac] ss:$12 sps:$4 sm:$0xff]   ;;  %v2339_v19 = vld [vmem:[#allocation2 + $0x90] ss:$12 sps:$4 sm:$0xff]  }
  0x20   :  { %2004 = vmatprep.subr.msk.bf16.mxu0 %vm117_vm0, %v2001_v4  ;;  %2013 = vmatprep.subr.msk.bf16.mxu1 %vm117_vm0, %v2003_v5  ;;  %v119_v9 = vsel %vm117_vm0, %v2000_v6, 0  ;;  %v59_v15 = vld [vmem:[%s3061_s0 + $0x18] sm:$0xff]  ;;  %v2341_v16 = vld [vmem:[#allocation2 + $0x94] ss:$12 sps:$4 sm:$0xff]   ;;  %v2350_v26 = vld [vmem:[#allocation2 + $0x64] ss:$12 sps:$4 sm:$0xff]  }
  0x21   :  { %v125_v10 = vsel %vm117_vm0, %v2002_v7, 0  ;;  %145 = vmatpush1.bf16.msra.mxu0 %v119_v9  ;;  %v2342_v17 = vld [vmem:[#allocation2 + $0x228] ss:$12 sps:$4 sm:$0xff]   ;;  %v2344_v18 = vld [vmem:[#allocation2 + $0x22c] ss:$12 sps:$4 sm:$0xff]   ;;  %v73_v20 = vpack.c.bf16 %v59_v15, %v58_v12  ;;  %v60_v24 = vld [vmem:[%s3061_s0 + $0x20] sm:$0xff] }
  0x22   :  { %258 = vmatpush1.bf16.msra.mxu1 %v125_v10  ;;  %1031 = vmatprep.subr.bf16.mxu0 %v2338_v14  ;;  %v2345_v21 = vld [vmem:[#allocation2 + $0x78] ss:$12 sps:$4 sm:$0xff]   ;;  %v2347_v22 = vld [vmem:[#allocation2 + $0x7c] ss:$12 sps:$4 sm:$0xff]   ;;  %v2353_v23 = vld [vmem:[#allocation2 + $0x214] ss:$12 sps:$4 sm:$0xff]  }
  0x23   :  { %1144 = vmatprep.subr.bf16.mxu1 %v2344_v18  ;;  %v2351_v25 = vld [vmem:[#allocation2 + $0x210] ss:$12 sps:$4 sm:$0xff]   ;;  %v61_v27 = vld [vmem:[%s3061_s0 + $0x28] sm:$0xff]  ;;  %v2357_v30 = vld [vmem:[#allocation2 + $0x1f8] ss:$12 sps:$4 sm:$0xff]   ;;  %vm1006_vm2 = vcmask 130048  }
  0x24   :  { %2005 = vmatmul.mubr.msk.bf16.vlgmr.msra.gmra.mxu0 %vm92_vm1, %v72_v11  ;;  %v2359_v28 = vld [vmem:[#allocation2 + $0x1fc] ss:$12 sps:$4 sm:$0xff]   ;;  %v2348_v29 = vld [vmem:[#allocation2 + $0x60] ss:$12 sps:$4 sm:$0xff]   ;;  %v74_v31 = vpack.c.bf16 %v61_v27, %v60_v24  ;;  %v2368_v34 = vld [vmem:[#allocation2 + $0x1e4] ss:$12 sps:$4 sm:$0xff]  }
  0x25   :  { %2014 = vmatmul.mubr.msk.bf16.vlgmr.msra.gmra.mxu1 %vm92_vm1, %v72_v11  ;;  %172 = vmatprep.mubr.bf16.mxu0 %v2559_v0  ;;  %v2354_v32 = vld [vmem:[#allocation2 + $0x48] ss:$12 sps:$4 sm:$0xff]   ;;  %v2356_v33 = vld [vmem:[#allocation2 + $0x4c] ss:$12 sps:$4 sm:$0xff]   ;;  %v2360_v40 = vld [vmem:[#allocation2 + $0x30] ss:$12 sps:$4 sm:$0xff]  }
  0x26   :  { %285 = vmatprep.mubr.bf16.mxu1 %v2559_v0  ;;  %1032 = vmatpush1.bf16.msra.mxu0 %v2336_v13  ;;  %v62_v35 = vld [vmem:[%s3061_s0 + $0x30] sm:$0xff]  ;;  %v2366_v36 = vld [vmem:[#allocation2 + $0x1e0] ss:$12 sps:$4 sm:$0xff]   ;;  %v63_v38 = vld [vmem:[%s3061_s0 + $0x38] sm:$0xff]  ;;  %vm1752_vm3 = vcmask 1045504   ;;  %vm1727_vm4 = vcmask 359424  }
  0x27   :  { %1033 = vmatprep.subr.bf16.mxu0 %v2341_v16  ;;  %1145 = vmatpush1.bf16.msra.mxu1 %v2342_v17  ;;  %v2362_v37 = vld [vmem:[#allocation2 + $0x34] ss:$12 sps:$4 sm:$0xff]   ;;  %v2377_v39 = vld [vmem:[#allocation2 + $0x1cc] ss:$12 sps:$4 sm:$0xff]   ;;  %v75_v42 = vpack.c.bf16 %v63_v38, %v62_v35  ;;  %v2365_v44 = vld [vmem:[#allocation2 + $0x1c] ss:$12 sps:$4 sm:$0xff]  }
  0x28   :  { %1146 = vmatprep.subr.bf16.mxu1 %v2353_v23  ;;  %v2375_v41 = vld [vmem:[#allocation2 + $0x1c8] ss:$12 sps:$4 sm:$0xff]   ;;  %v2363_v43 = vld [vmem:[#allocation2 + $0x18] ss:$12 sps:$4 sm:$0xff]   ;;  %v2384_v49 = vld [vmem:[#allocation2 + $0x1b0] ss:$12 sps:$4 sm:$0xff]   ;;  %v401_v23 = vlaneseq }
  0x29   :  { %v2371_v45 = vld [vmem:[#allocation2 + $0x4] ss:$12 sps:$4 sm:$0xff]   ;;  %v2386_v46 = vld [vmem:[#allocation2 + $0x1b4] ss:$12 sps:$4 sm:$0xff]   ;;  %v65_v48 = vld [vmem:[%s3061_s0 + $0x48] sm:$0xff] }
  0x2a   :  { %1034 = vmatpush1.bf16.msra.mxu0 %v2339_v19  ;;  %v64_v47 = vld [vmem:[%s3061_s0 + $0x40] sm:$0xff]  ;;  %v2392_v50 = vld [vmem:[#allocation2 + $0x19c] ss:$12 sps:$4 sm:$0xff]   ;;  %v2374_v54 = vld [vmem:[#allocation2 + $0x16c] ss:$12 sps:$4 sm:$0xff]  }
  0x2b   :  { %1035 = vmatprep.subr.bf16.mxu0 %v2347_v22  ;;  %1147 = vmatpush1.bf16.msra.mxu1 %v2351_v25  ;;  %v2369_v51 = vld [vmem:[#allocation2] ss:$12 sps:$4 sm:$0xff]   ;;  %v2390_v52 = vld [vmem:[#allocation2 + $0x198] ss:$12 sps:$4 sm:$0xff]   ;;  %v76_v53 = vpack.c.bf16 %v65_v48, %v64_v47  ;;  %v2372_v55 = vld [vmem:[#allocation2 + $0x168] ss:$12 sps:$4 sm:$0xff]  }
  0x2c   :  { %2006 = vmatmul.mubr.msk.bf16.gmra.mxu0 %vm92_vm1, %v73_v20  ;;  %1148 = vmatprep.subr.bf16.mxu1 %v2359_v28  ;;  %v2380_v56 = vld [vmem:[#allocation2 + $0x154] ss:$12 sps:$4 sm:$0xff]   ;;  %v67_v58 = vld [vmem:[%s3061_s0 + $0x58] sm:$0xff]  ;;  %v2389_v63 = vld [vmem:[#allocation2 + $0x124] ss:$12 sps:$4 sm:$0xff]   ;;  %v402_v25 = vshrl.u32 %v401_v23, 7 }
  0x2d   :  { %2015 = vmatmul.mubr.msk.bf16.gmra.mxu1 %vm92_vm1, %v73_v20  ;;  %182 = vmatprep.mubr.bf16.mxu0 %v2559_v0  ;;  %v66_v57 = vld [vmem:[%s3061_s0 + $0x50] sm:$0xff]  ;;  %v2383_v61 = vld [vmem:[#allocation2 + $0x13c] ss:$12 sps:$4 sm:$0xff]   ;;  %v2381_v62 = vld [vmem:[#allocation2 + $0x138] ss:$12 sps:$4 sm:$0xff]  }
  0x2e   :  { %295 = vmatprep.mubr.bf16.mxu1 %v2559_v0  ;;  %1036 = vmatpush1.bf16.msra.mxu0 %v2345_v21  ;;  %v2378_v59 = vld [vmem:[#allocation2 + $0x150] ss:$12 sps:$4 sm:$0xff]   ;;  %v77_v60 = vpack.c.bf16 %v67_v58, %v66_v57  ;;  %v68_v1 = vld [vmem:[%s3061_s0 + $0x60] sm:$0xff]  ;;  %v69_v2 = vld [vmem:[%s3061_s0 + $0x68] sm:$0xff]  ;;  %v2560_v21 = vmov 1966171168  }
  0x2f   :  { %1037 = vmatprep.subr.bf16.mxu0 %v2350_v26  ;;  %1149 = vmatpush1.bf16.msra.mxu1 %v2357_v30  ;;  %v2387_v3 = vld [vmem:[#allocation2 + $0x120] ss:$12 sps:$4 sm:$0xff]   ;;  %v78_v4 = vpack.c.bf16 %v69_v2, %v68_v1  ;;  %v2393_v6 = vld [vmem:[#allocation2 + $0x108] ss:$12 sps:$4 sm:$0xff]   ;;  %v71_v8 = vld [vmem:[%s3061_s0 + $0x78] sm:$0xff]  ;;  %v399_v22 = vunpack.c.l.s4 %v2560_v21 }
  0x30   :  { %1150 = vmatprep.subr.bf16.mxu1 %v2368_v34  ;;  %v2395_v5 = vld [vmem:[#allocation2 + $0x10c] ss:$12 sps:$4 sm:$0xff]   ;;  %v70_v7 = vld [vmem:[%s3061_s0 + $0x70] sm:$0xff]  ;;  %v2404_v14 = vld [vmem:[#allocation2 + $0xdc] ss:$12 sps:$4 sm:$0xff]  }
  0x31   :  { %v79_v9 = vpack.c.bf16 %v71_v8, %v70_v7  ;;  %v2396_v10 = vld [vmem:[#allocation2 + $0xf0] ss:$12 sps:$4 sm:$0xff]   ;;  %v2398_v11 = vld [vmem:[#allocation2 + $0xf4] ss:$12 sps:$4 sm:$0xff]   ;;  %v2402_v15 = vld [vmem:[#allocation2 + $0xd8] ss:$12 sps:$4 sm:$0xff]   ;;  %v400_v24 = vunpack.c.0.s8 %v399_v22 }
  0x32   :  { %1038 = vmatpush1.bf16.msra.mxu0 %v2348_v29  ;;  %v2399_v12 = vld [vmem:[#allocation2 + $0x180] ss:$12 sps:$4 sm:$0xff]   ;;  %v2401_v13 = vld [vmem:[#allocation2 + $0x184] ss:$12 sps:$4 sm:$0xff]  }
  0x33   :  { %1039 = vmatprep.subr.bf16.mxu0 %v2356_v33  ;;  %1151 = vmatpush1.bf16.msra.mxu1 %v2366_v36  ;;  %v2407_v16 = vld [vmem:[#allocation2 + $0xc4] ss:$12 sps:$4 sm:$0xff]   ;;  %v2405_v18 = vld [vmem:[#allocation2 + $0xc0] ss:$12 sps:$4 sm:$0xff]   ;;  %v2700_v27 = vsub.s32 %v400_v24, %v402_v25  ;;  %v2704_v36 = vsub.s32 0, %v402_v25 }
  0x34   :  { %2007 = vmatmul.mubr.msk.bf16.gmra.mxu0 %vm92_vm1, %v74_v31  ;;  %1152 = vmatprep.subr.bf16.mxu1 %v2377_v39  ;;  %v2410_v17 = vld [vmem:[#allocation2 + $0x244] ss:$12 sps:$4 sm:$0xff]   ;;  %v2408_v19 = vld [vmem:[#allocation2 + $0x240] ss:$12 sps:$4 sm:$0xff]  }
  0x35   :  { %2016 = vmatmul.mubr.msk.bf16.gmra.mxu1 %vm92_vm1, %v74_v31  ;;  %192 = vmatprep.mubr.bf16.mxu0 %v2559_v0  ;;  %v2411_v20 = vld [vmem:[#allocation2 + $0x170] ss:$12 sps:$4 sm:$0xff]   ;;  %v2022_v26 = vld.sshfl [vmem:[%s3063_s2] sm:$0x33 pattern:$0x75316420] }
  0x36   :  { %305 = vmatprep.mubr.bf16.mxu1 %v2559_v0  ;;  %1040 = vmatpush1.bf16.msra.mxu0 %v2354_v32  ;;  %v397_v28 = vcombine.high %v2022_v26, %v2022_v26  ;;  %v404_v29 = vrot.slane %v2022_v26, %v2700_v27  ;;  %v2412_v1 = vld [vmem:[#allocation2 + $0xb0] ss:$12 sps:$4 sm:$0xff]   ;;  %v2414_v7 = vld [vmem:[#allocation2 + $0x158] ss:$12 sps:$4 sm:$0xff]  }
  0x37   :  { %1041 = vmatprep.subr.bf16.mxu0 %v2362_v37  ;;  %1153 = vmatpush1.bf16.msra.mxu1 %v2375_v41 }
  0x38   :  { %1154 = vmatprep.subr.bf16.mxu1 %v2386_v46  ;;  %v411_v30 = vrot.slane %v397_v28, %v2700_v27  ;;  %v412_v31 = vcombine.high %v404_v29, %v404_v29  ;;  %v415_v35 = vpack.i.b16 %v404_v29, %v404_v29  ;;  %v2418_v28 = vld [vmem:[#allocation2 + $0x80] ss:$12 sps:$4 sm:$0xff]  }
  0x3a   :  { %1042 = vmatpush1.bf16.msra.mxu0 %v2360_v40  ;;  %v413_v32 = vcombine.high %v411_v30, %v411_v30  ;;  %v429_v37 = vpack.i.b16 %v412_v31, %v412_v31  ;;  %v422_v38 = vpack.i.b16 %v411_v30, %v411_v30 }
  0x3b   :  { %1043 = vmatprep.subr.bf16.mxu0 %v2365_v44  ;;  %1155 = vmatpush1.bf16.msra.mxu1 %v2384_v49 }
  0x3c   :  { %2008 = vmatmul.mubr.msk.bf16.gmra.mxu0 %vm92_vm1, %v75_v42  ;;  %1156 = vmatprep.subr.bf16.mxu1 %v2392_v50  ;;  %v436_v39 = vpack.i.b16 %v413_v32, %v413_v32  ;;  %v2713_v48 = vrot.slane %v422_v38, %v2704_v36 }
  0x3d   :  { %2017 = vmatmul.mubr.msk.bf16.gmra.mxu1 %vm92_vm1, %v75_v42  ;;  %202 = vmatprep.mubr.bf16.mxu0 %v2559_v0 }
  0x3e   :  { %315 = vmatprep.mubr.bf16.mxu1 %v2559_v0  ;;  %1044 = vmatpush1.bf16.msra.mxu0 %v2363_v43  ;;  %v2707_v43 = vrot.slane %v415_v35, %v2704_v36  ;;  %v2716_v49 = vrot.slane %v436_v39, %v2704_v36 }
  0x3f   :  { %1045 = vmatprep.subr.bf16.mxu0 %v2371_v45  ;;  %1157 = vmatpush1.bf16.msra.mxu1 %v2390_v52  ;;  %v2710_v45 = vrot.slane %v429_v37, %v2704_v36  ;;  %v2419_v37 = vld [vmem:[#allocation2 + $0x200] ss:$12 sps:$4 sm:$0xff]  }
  0x40   :  { %1158 = vmatprep.subr.bf16.mxu1 %v2401_v13 }
  0x42   :  { %1046 = vmatpush1.bf16.msra.mxu0 %v2369_v51 }
  0x43   :  { %1047 = vmatprep.subr.bf16.mxu0 %v2374_v54  ;;  %1159 = vmatpush1.bf16.msra.mxu1 %v2399_v12 }
  0x44   :  { %2009 = vmatmul.mubr.msk.bf16.gmra.mxu0 %vm92_vm1, %v76_v53  ;;  %1174 = vmatprep.subr.bf16.mxu1 %v2410_v17 }
  0x45   :  { %2018 = vmatmul.mubr.msk.bf16.gmra.mxu1 %vm92_vm1, %v76_v53  ;;  %212 = vmatprep.mubr.bf16.mxu0 %v2559_v0 }
  0x46   :  { %325 = vmatprep.mubr.bf16.mxu1 %v2559_v0  ;;  %1048 = vmatpush2.bf16.msra.mxu0 %v2372_v55 }
  0x47   :  { %1049 = vmatprep.subr.bf16.mxu0 %v2380_v56  ;;  %1175 = vmatpush2.bf16.msra.mxu1 %v2408_v19  ;;  %v2416_v19 = vld [vmem:[#allocation2 + $0x218] ss:$12 sps:$4 sm:$0xff]  }
  0x48   :  { %1354 = vmatprep.subr.bf16.mxu1 %v2559_v0 }
  0x4a   :  { %1050 = vmatpush2.bf16.msra.mxu0 %v2378_v59 }
  0x4b   :  { %1051 = vmatprep.subr.bf16.mxu0 %v2383_v61 }
  0x4c   :  { %2010 = vmatmul.mubr.msk.bf16.gmra.mxu0 %vm92_vm1, %v77_v60 }
  0x4d   :  { %2019 = vmatmul.mubr.msk.bf16.gmra.mxu1 %vm92_vm1, %v77_v60  ;;  %222 = vmatprep.mubr.bf16.mxu0 %v2559_v0 }
  0x4e   :  { %335 = vmatprep.mubr.bf16.mxu1 %v2559_v0  ;;  %1052 = vmatpush2.bf16.msra.mxu0 %v2381_v62 }
  0x4f   :  { %1053 = vmatprep.subr.bf16.mxu0 %v2389_v63 }
  0x52   :  { %1054 = vmatpush2.bf16.msra.mxu0 %v2387_v3 }
  0x53   :  { %1055 = vmatprep.subr.bf16.mxu0 %v2395_v5 }
  0x54   :  { %2011 = vmatmul.mubr.msk.bf16.gmra.mxu0 %vm92_vm1, %v78_v4 }
  0x55   :  { %2020 = vmatmul.mubr.msk.bf16.gmra.mxu1 %vm92_vm1, %v78_v4  ;;  %232 = vmatprep.mubr.bf16.mxu0 %v2559_v0 }
  0x56   :  { %345 = vmatprep.mubr.bf16.mxu1 %v2559_v0  ;;  %1056 = vmatpush2.bf16.msra.mxu0 %v2393_v6  ;;  %v2413_v6 = vld [vmem:[#allocation2 + $0x230] ss:$12 sps:$4 sm:$0xff]  }
  0x57   :  { %1057 = vmatprep.subr.bf16.mxu0 %v2398_v11 }
  0x5a   :  { %1058 = vmatpush2.bf16.msra.mxu0 %v2396_v10 }
  0x5b   :  { %1059 = vmatprep.subr.bf16.mxu0 %v2404_v14  ;;  %v2415_v14 = vld [vmem:[#allocation2 + $0x98] ss:$12 sps:$4 sm:$0xff]  }
  0x5c   :  { %2012 = vmatmul.mubr.msk.bf16.gmra.mxu0 %vm92_vm1, %v79_v9 }
  0x5d   :  { %2021 = vmatmul.mubr.msk.bf16.gmra.mxu1 %vm92_vm1, %v79_v9 }
  0x5e   :  { %1060 = vmatpush2.bf16.msra.mxu0 %v2402_v15 }
  0x5f   :  { %1061 = vmatprep.subr.bf16.mxu0 %v2407_v16 }
  0x62   :  { %1062 = vmatpush2.bf16.msra.mxu0 %v2405_v18 }
  0x63   :  { %2143 = vmatprep.subr.bf16.mxu0 %v2411_v20  ;;  %v2417_v20 = vld [vmem:[#allocation2 + $0x140] ss:$12 sps:$4 sm:$0xff]  }
  0xe4   :  { %v164_v33 = vpop.f32.mrf.mxu0 }
  0xe5   :  { %v277_v34 = vpop.f32.mrf.mxu1 }
  0xe6   :  { %v166_v40 = vpop.f32.mrf.mxu0 }
  0xe7   :  { %v279_v41 = vpop.f32.mrf.mxu1 }
  0xe8   :  { %v168_v42 = vpop.f32.mrf.mxu0 }
  0xe9   :  { %v281_v44 = vpop.f32.mrf.mxu1  ;;  %v356_v46 = vpack.c.bf16 %v168_v42, %v164_v33  ;;  %v2420_v33 = vld [vmem:[#allocation2 + $0x128] ss:$12 sps:$4 sm:$0xff]  }
  0xea   :  { %v358_v47 = vpack.c.bf16 %v281_v44, %v277_v34  ;;  %v170_v50 = vpop.f32.mrf.mxu0  ;;  %v2421_v42 = vld [vmem:[#allocation2 + $0x68] ss:$12 sps:$4 sm:$0xff]  }
  0xeb   :  { %v283_v51 = vpop.f32.mrf.mxu1  ;;  %v357_v52 = vpack.c.bf16 %v170_v50, %v166_v40  ;;  %v442_v54 = vadd.bf16 %v2707_v43, %v356_v46 }
  0xec   :  { %v359_v53 = vpack.c.bf16 %v283_v51, %v279_v41  ;;  %v444_v55 = vadd.bf16 %v2710_v45, %v358_v47  ;;  %v174_v56 = vpop.f32.mrf.mxu0  ;;  %v2423_v51 = vld [vmem:[#allocation2 + $0x110] ss:$12 sps:$4 sm:$0xff]  }
  0xed   :  { %v287_v57 = vpop.f32.mrf.mxu1  ;;  %v443_v58 = vadd.bf16 %v2713_v48, %v357_v52  ;;  %v2729_v2 = vmax.bf16 %v2559_v0, %v442_v54 }
  0xee   :  { %v445_v59 = vadd.bf16 %v2716_v49, %v359_v53  ;;  %v176_v60 = vpop.f32.mrf.mxu0  ;;  %v2732_v3 = vmax.bf16 %v2559_v0, %v444_v55 }
  0xef   :  { %v289_v61 = vpop.f32.mrf.mxu1  ;;  %v2726_v63 = vmax.bf16 %v2559_v0, %v443_v58  ;;  %v2422_v58 = vld [vmem:[#allocation2 + $0x1e8] ss:$12 sps:$4 sm:$0xff]  }
  0xf0   :  { %v2723_v62 = vmax.bf16 %v2559_v0, %v445_v59  ;;  %v178_v4 = vpop.f32.mrf.mxu0 }
  0xf1   :  { %v291_v5 = vpop.f32.mrf.mxu1  ;;  %v360_v8 = vpack.c.bf16 %v178_v4, %v174_v56  ;;  %1063 = vmatprep.mubr.bf16.mxu0 %v2726_v63  ;;  %v2424_v4 = vld [vmem:[#allocation2 + $0x50] ss:$12 sps:$4 sm:$0xff]  }
  0xf2   :  { %v362_v9 = vpack.c.bf16 %v291_v5, %v287_v57  ;;  %2098 = vmatprep.mubr.msk.bf16.mxu1 %vm1006_vm2, %v2723_v62  ;;  %v180_v10 = vpop.f32.mrf.mxu0  ;;  %1064 = vmatmul.mubr.bf16.vlgmr.msra.gmra.mxu0 %v2729_v2 }
  0xf3   :  { %v293_v11 = vpop.f32.mrf.mxu1  ;;  %1177 = vmatmul.mubr.bf16.vlgmr.msra.gmra.mxu1 %v2732_v3  ;;  %v361_v12 = vpack.c.bf16 %v180_v10, %v176_v60  ;;  %2144 = vmatpush3.bf16.msra.mxu0 %v2412_v1  ;;  %v446_v15 = vadd.bf16 %v2707_v43, %v360_v8 }
  0xf4   :  { %v363_v13 = vpack.c.bf16 %v293_v11, %v289_v61  ;;  %v448_v16 = vadd.bf16 %v2710_v45, %v362_v9  ;;  %v184_v17 = vpop.f32.mrf.mxu0  ;;  %1355 = vmatpush1.bf16.msra.mxu1 %v2413_v6  ;;  %2145 = vmatprep.subr.bf16.mxu0 %v2414_v7  ;;  %v2426_v7 = vld [vmem:[#allocation2 + $0xf8] ss:$12 sps:$4 sm:$0xff]  }
  0xf5   :  { %v297_v18 = vpop.f32.mrf.mxu1  ;;  %v447_v21 = vadd.bf16 %v2713_v48, %v361_v12  ;;  %1356 = vmatprep.subr.bf16.mxu1 %v2559_v0  ;;  %v2751_v31 = vmax.bf16 %v2559_v0, %v446_v15  ;;  %v2425_v12 = vld [vmem:[#allocation2 + $0x1d0] ss:$12 sps:$4 sm:$0xff]  }
  0xf6   :  { %v449_v22 = vadd.bf16 %v2716_v49, %v363_v13  ;;  %v186_v23 = vpop.f32.mrf.mxu0  ;;  %v2754_v32 = vmax.bf16 %v2559_v0, %v448_v16 }
  0xf7   :  { %v299_v24 = vpop.f32.mrf.mxu1  ;;  %v2748_v26 = vmax.bf16 %v2559_v0, %v447_v21  ;;  %2146 = vmatpush3.bf16.msra.mxu0 %v2415_v14 }
  0xf8   :  { %v2745_v25 = vmax.bf16 %v2559_v0, %v449_v22  ;;  %v188_v29 = vpop.f32.mrf.mxu0  ;;  %1357 = vmatpush1.bf16.msra.mxu1 %v2416_v19  ;;  %2147 = vmatprep.subr.bf16.mxu0 %v2417_v20 }
  0xf9   :  { %v301_v30 = vpop.f32.mrf.mxu1  ;;  %v364_v34 = vpack.c.bf16 %v188_v29, %v184_v17  ;;  %1073 = vmatprep.mubr.bf16.mxu0 %v2748_v26  ;;  %1358 = vmatprep.subr.bf16.mxu1 %v2559_v0  ;;  %v2427_v17 = vld [vmem:[#allocation2 + $0x38] ss:$12 sps:$4 sm:$0xff]  }
  0xfa   :  { %v366_v35 = vpack.c.bf16 %v301_v30, %v297_v18  ;;  %2099 = vmatprep.mubr.msk.bf16.mxu1 %vm1006_vm2, %v2745_v25  ;;  %v190_v38 = vpop.f32.mrf.mxu0  ;;  %1074 = vmatmul.mubr.bf16.gmra.mxu0 %v2751_v31 }
  0xfb   :  { %v303_v39 = vpop.f32.mrf.mxu1  ;;  %1187 = vmatmul.mubr.bf16.gmra.mxu1 %v2754_v32  ;;  %v365_v40 = vpack.c.bf16 %v190_v38, %v186_v23  ;;  %2148 = vmatpush3.bf16.msra.mxu0 %v2418_v28  ;;  %v450_v44 = vadd.bf16 %v2707_v43, %v364_v34  ;;  %v2429_v34 = vld [vmem:[#allocation2 + $0xe0] ss:$12 sps:$4 sm:$0xff]  }
  0xfc   :  { %v367_v41 = vpack.c.bf16 %v303_v39, %v299_v24  ;;  %v452_v46 = vadd.bf16 %v2710_v45, %v366_v35  ;;  %v194_v47 = vpop.f32.mrf.mxu0  ;;  %2149 = vmatprep.subr.bf16.mxu0 %v2420_v33  ;;  %1359 = vmatpush1.bf16.msra.mxu1 %v2419_v37  ;;  %v2428_v24 = vld [vmem:[#allocation2 + $0x1b8] ss:$12 sps:$4 sm:$0xff]   ;;  %v2431_v38 = vld [vmem:[#allocation2 + $0x20] ss:$12 sps:$4 sm:$0xff]  }
  0xfd   :  { %v307_v50 = vpop.f32.mrf.mxu1  ;;  %v451_v52 = vadd.bf16 %v2713_v48, %v365_v40  ;;  %1360 = vmatprep.subr.bf16.mxu1 %v2559_v0  ;;  %v2774_v61 = vmax.bf16 %v2559_v0, %v450_v44 }
  0xfe   :  { %v453_v53 = vadd.bf16 %v2716_v49, %v367_v41  ;;  %v196_v54 = vpop.f32.mrf.mxu0  ;;  %v2777_v1 = vmax.bf16 %v2559_v0, %v452_v46  ;;  %v2433_v41 = vld [vmem:[#allocation2 + $0xc8] ss:$12 sps:$4 sm:$0xff]   ;;  %v2430_v46 = vld [vmem:[#allocation2 + $0x1a0] ss:$12 sps:$4 sm:$0xff]  }
  0xff   :  { %v309_v55 = vpop.f32.mrf.mxu1  ;;  %v2771_v57 = vmax.bf16 %v2559_v0, %v451_v52  ;;  %2150 = vmatpush3.bf16.msra.mxu0 %v2421_v42 }
 0x100   :  { %v2768_v56 = vmax.bf16 %v2559_v0, %v453_v53  ;;  %v198_v59 = vpop.f32.mrf.mxu0  ;;  %2151 = vmatprep.subr.bf16.mxu0 %v2423_v51  ;;  %1361 = vmatpush1.bf16.msra.mxu1 %v2422_v58 }
 0x101   :  { %v311_v60 = vpop.f32.mrf.mxu1  ;;  %v368_v5 = vpack.c.bf16 %v198_v59, %v194_v47  ;;  %1083 = vmatprep.mubr.bf16.mxu0 %v2771_v57  ;;  %1362 = vmatprep.subr.bf16.mxu1 %v2559_v0 }
 0x102   :  { %v370_v6 = vpack.c.bf16 %v311_v60, %v307_v50  ;;  %2100 = vmatprep.mubr.msk.bf16.mxu1 %vm1006_vm2, %v2768_v56  ;;  %v200_v8 = vpop.f32.mrf.mxu0  ;;  %1084 = vmatmul.mubr.bf16.gmra.mxu0 %v2774_v61 }
 0x103   :  { %v313_v9 = vpop.f32.mrf.mxu1  ;;  %1197 = vmatmul.mubr.bf16.gmra.mxu1 %v2777_v1  ;;  %v369_v10 = vpack.c.bf16 %v200_v8, %v196_v54  ;;  %v454_v13 = vadd.bf16 %v2707_v43, %v368_v5  ;;  %2152 = vmatpush3.bf16.msra.mxu0 %v2424_v4  ;;  %v2432_v4 = vld [vmem:[#allocation2 + $0x188] ss:$12 sps:$4 sm:$0xff]  }
 0x104   :  { %v371_v11 = vpack.c.bf16 %v313_v9, %v309_v55  ;;  %v456_v14 = vadd.bf16 %v2710_v45, %v370_v6  ;;  %v204_v15 = vpop.f32.mrf.mxu0  ;;  %2153 = vmatprep.subr.bf16.mxu0 %v2426_v7  ;;  %1363 = vmatpush1.bf16.msra.mxu1 %v2425_v12  ;;  %v2434_v9 = vld [vmem:[#allocation2 + $0x8] ss:$12 sps:$4 sm:$0xff]  }
 0x105   :  { %v317_v16 = vpop.f32.mrf.mxu1  ;;  %v455_v18 = vadd.bf16 %v2713_v48, %v369_v10  ;;  %v2796_v30 = vmax.bf16 %v2559_v0, %v454_v13  ;;  %1364 = vmatprep.subr.bf16.mxu1 %v2559_v0  ;;  %v2436_v12 = vld [vmem:[#allocation5 + $0x78] sm:$0xff]  }
 0x106   :  { %v457_v19 = vadd.bf16 %v2716_v49, %v371_v11  ;;  %v206_v20 = vpop.f32.mrf.mxu0  ;;  %v2799_v33 = vmax.bf16 %v2559_v0, %v456_v14 }
 0x107   :  { %v319_v21 = vpop.f32.mrf.mxu1  ;;  %v2793_v23 = vmax.bf16 %v2559_v0, %v455_v18  ;;  %2154 = vmatpush3.bf16.msra.mxu0 %v2427_v17  ;;  %v2435_v17 = vld [vmem:[#allocation2 + $0x248] ss:$12 sps:$4 sm:$0xff]  }
 0x108   :  { %v2790_v22 = vmax.bf16 %v2559_v0, %v457_v19  ;;  %v208_v28 = vpop.f32.mrf.mxu0  ;;  %1365 = vmatpush1.bf16.msra.mxu1 %v2428_v24  ;;  %2155 = vmatprep.subr.bf16.mxu0 %v2429_v34 }
 0x109   :  { %v321_v29 = vpop.f32.mrf.mxu1  ;;  %v372_v35 = vpack.c.bf16 %v208_v28, %v204_v15  ;;  %1093 = vmatprep.mubr.bf16.mxu0 %v2793_v23  ;;  %1366 = vmatprep.subr.bf16.mxu1 %v2559_v0 }
 0x10a   :  { %v374_v37 = vpack.c.bf16 %v321_v29, %v317_v16  ;;  %2101 = vmatprep.mubr.msk.bf16.mxu1 %vm1006_vm2, %v2790_v22  ;;  %v210_v39 = vpop.f32.mrf.mxu0  ;;  %1094 = vmatmul.mubr.bf16.gmra.mxu0 %v2796_v30 }
 0x10b   :  { %v323_v40 = vpop.f32.mrf.mxu1  ;;  %1207 = vmatmul.mubr.bf16.gmra.mxu1 %v2799_v33  ;;  %v373_v42 = vpack.c.bf16 %v210_v39, %v206_v20  ;;  %v458_v47 = vadd.bf16 %v2707_v43, %v372_v35  ;;  %2156 = vmatpush3.bf16.msra.mxu0 %v2431_v38 }
 0x10c   :  { %v375_v44 = vpack.c.bf16 %v323_v40, %v319_v21  ;;  %v460_v50 = vadd.bf16 %v2710_v45, %v374_v37  ;;  %v214_v51 = vpop.f32.mrf.mxu0  ;;  %2157 = vmatprep.subr.bf16.mxu0 %v2433_v41  ;;  %1367 = vmatpush1.bf16.msra.mxu1 %v2430_v46 }
 0x10d   :  { %v327_v52 = vpop.f32.mrf.mxu1  ;;  %v459_v53 = vadd.bf16 %v2713_v48, %v373_v42  ;;  %v2819_v7 = vmax.bf16 %v2559_v0, %v458_v47  ;;  %1368 = vmatprep.subr.bf16.mxu1 %v2559_v0 }
 0x10e   :  { %v461_v54 = vadd.bf16 %v2716_v49, %v375_v44  ;;  %v216_v55 = vpop.f32.mrf.mxu0  ;;  %v2822_v8 = vmax.bf16 %v2559_v0, %v460_v50 }
 0x10f   :  { %v329_v58 = vpop.f32.mrf.mxu1  ;;  %v2816_v60 = vmax.bf16 %v2559_v0, %v459_v53  ;;  %2158 = vmatpush3.bf16.msra.mxu0 %v2434_v9 }
 0x110   :  { %v2813_v59 = vmax.bf16 %v2559_v0, %v461_v54  ;;  %v218_v5 = vpop.f32.mrf.mxu0  ;;  %1369 = vmatpush1.bf16.msra.mxu1 %v2432_v4  ;;  %2207 = vmatprep.subr.bf16.mxu0 %v2436_v12 }
 0x111   :  { %v331_v6 = vpop.f32.mrf.mxu1  ;;  %v376_v10 = vpack.c.bf16 %v218_v5, %v214_v51  ;;  %1103 = vmatprep.mubr.bf16.mxu0 %v2816_v60  ;;  %1384 = vmatprep.subr.bf16.mxu1 %v2559_v0 }
 0x112   :  { %v378_v11 = vpack.c.bf16 %v331_v6, %v327_v52  ;;  %2102 = vmatprep.mubr.msk.bf16.mxu1 %vm1006_vm2, %v2813_v59  ;;  %v220_v13 = vpop.f32.mrf.mxu0  ;;  %1104 = vmatmul.mubr.bf16.gmra.mxu0 %v2819_v7 }
 0x113   :  { %v333_v14 = vpop.f32.mrf.mxu1  ;;  %1217 = vmatmul.mubr.bf16.gmra.mxu1 %v2822_v8  ;;  %v377_v15 = vpack.c.bf16 %v220_v13, %v216_v55  ;;  %v462_v18 = vadd.bf16 %v2707_v43, %v376_v10 }
 0x114   :  { %v379_v16 = vpack.c.bf16 %v333_v14, %v329_v58  ;;  %v464_v19 = vadd.bf16 %v2710_v45, %v378_v11  ;;  %v224_v20 = vpop.f32.mrf.mxu0  ;;  %1385 = vmatpush2.bf16.msra.mxu1 %v2435_v17 }
 0x115   :  { %v337_v21 = vpop.f32.mrf.mxu1  ;;  %v463_v24 = vadd.bf16 %v2713_v48, %v377_v15  ;;  %v2842_v40 = vmax.bf16 %v2559_v0, %v462_v18  ;;  %2304 = vmatprep.subr.bf16.mxu1 %v2436_v12 }
 0x116   :  { %v465_v28 = vadd.bf16 %v2716_v49, %v379_v16  ;;  %v226_v29 = vpop.f32.mrf.mxu0  ;;  %v2845_v41 = vmax.bf16 %v2559_v0, %v464_v19 }
 0x117   :  { %v339_v34 = vpop.f32.mrf.mxu1  ;;  %v2839_v37 = vmax.bf16 %v2559_v0, %v463_v24 }
 0x118   :  { %v2836_v35 = vmax.bf16 %v2559_v0, %v465_v28  ;;  %v228_v38 = vpop.f32.mrf.mxu0 }
 0x119   :  { %v341_v39 = vpop.f32.mrf.mxu1  ;;  %v380_v42 = vpack.c.bf16 %v228_v38, %v224_v20  ;;  %1113 = vmatprep.mubr.bf16.mxu0 %v2839_v37 }
 0x11a   :  { %v382_v44 = vpack.c.bf16 %v341_v39, %v337_v21  ;;  %2103 = vmatprep.mubr.msk.bf16.mxu1 %vm1006_vm2, %v2836_v35  ;;  %v230_v46 = vpop.f32.mrf.mxu0  ;;  %1114 = vmatmul.mubr.bf16.gmra.mxu0 %v2842_v40 }
 0x11b   :  { %v343_v47 = vpop.f32.mrf.mxu1  ;;  %1227 = vmatmul.mubr.bf16.gmra.mxu1 %v2845_v41  ;;  %v381_v50 = vpack.c.bf16 %v230_v46, %v226_v29  ;;  %v466_v52 = vadd.bf16 %v2707_v43, %v380_v42 }
 0x11c   :  { %v383_v51 = vpack.c.bf16 %v343_v47, %v339_v34  ;;  %v468_v53 = vadd.bf16 %v2710_v45, %v382_v44  ;;  %v234_v54 = vpop.f32.mrf.mxu0 }
 0x11d   :  { %v347_v55 = vpop.f32.mrf.mxu1  ;;  %v467_v58 = vadd.bf16 %v2713_v48, %v381_v50  ;;  %v2863_v13 = vmax.bf16 %v2559_v0, %v466_v52 }
 0x11e   :  { %v469_v4 = vadd.bf16 %v2716_v49, %v383_v51  ;;  %v236_v5 = vpop.f32.mrf.mxu0  ;;  %v2866_v14 = vmax.bf16 %v2559_v0, %v468_v53 }
 0x11f   :  { %v349_v6 = vpop.f32.mrf.mxu1  ;;  %v2860_v10 = vmax.bf16 %v2559_v0, %v467_v58 }
 0x120   :  { %v2857_v9 = vmax.bf16 %v2559_v0, %v469_v4  ;;  %v238_v11 = vpop.f32.mrf.mxu0 }
 0x121   :  { %v351_v12 = vpop.f32.mrf.mxu1  ;;  %v384_v15 = vpack.c.bf16 %v238_v11, %v234_v54  ;;  %1123 = vmatprep.mubr.bf16.mxu0 %v2860_v10 }
 0x122   :  { %v386_v16 = vpack.c.bf16 %v351_v12, %v347_v55  ;;  %2104 = vmatprep.mubr.msk.bf16.mxu1 %vm1006_vm2, %v2857_v9  ;;  %v240_v17 = vpop.f32.mrf.mxu0  ;;  %1124 = vmatmul.mubr.bf16.gmra.mxu0 %v2863_v13 }
 0x123   :  { %v353_v18 = vpop.f32.mrf.mxu1  ;;  %1237 = vmatmul.mubr.bf16.gmra.mxu1 %v2866_v14  ;;  %v385_v19 = vpack.c.bf16 %v240_v17, %v236_v5  ;;  %v470_v21 = vadd.bf16 %v2707_v43, %v384_v15  ;;  %v2437_v43 = vld [vmem:[#allocation5 + $0x38] sm:$0xff]  }
 0x124   :  { %v387_v20 = vpack.c.bf16 %v353_v18, %v349_v6  ;;  %v472_v24 = vadd.bf16 %v2710_v45, %v386_v16  ;;  %v2438_v45 = vld [vmem:[#allocation5 + $0x70] sm:$0xff]  }
 0x125   :  { %v471_v28 = vadd.bf16 %v2713_v48, %v385_v19  ;;  %v2884_v39 = vmax.bf16 %v2559_v0, %v470_v21  ;;  %v2439_v48 = vld [vmem:[#allocation5 + $0x30] sm:$0xff]  }
 0x126   :  { %v473_v29 = vadd.bf16 %v2716_v49, %v387_v20  ;;  %v2887_v42 = vmax.bf16 %v2559_v0, %v472_v24  ;;  %v2440_v49 = vld [vmem:[#allocation5 + $0x68] sm:$0xff]  }
 0x127   :  { %v2881_v38 = vmax.bf16 %v2559_v0, %v471_v28 }
 0x128   :  { %v2878_v34 = vmax.bf16 %v2559_v0, %v473_v29 }
 0x129   :  { %1133 = vmatprep.mubr.bf16.mxu0 %v2881_v38 }
 0x12a   :  { %2105 = vmatprep.mubr.msk.bf16.mxu1 %vm1006_vm2, %v2878_v34  ;;  %1134 = vmatmul.mubr.bf16.gmra.mxu0 %v2884_v39 }
 0x12b   :  { %1247 = vmatmul.mubr.bf16.gmra.mxu1 %v2887_v42  ;;  %1289 = vmatprep.mubr.bf16.mxu0 %v2726_v63  ;;  %v2441_v63 = vld [vmem:[#allocation5 + $0x28] sm:$0xff]  }
 0x12c   :  { %2106 = vmatprep.mubr.msk.bf16.mxu1 %vm1006_vm2, %v2723_v62  ;;  %v2442_v62 = vld [vmem:[#allocation5 + $0x60] sm:$0xff]  }
 0x132   :  { %1290 = vmatmul.mubr.bf16.vlgmr.msra.gmra.mxu0 %v2729_v2  ;;  %v2443_v2 = vld [vmem:[#allocation5 + $0x20] sm:$0xff]  }
 0x133   :  { %1387 = vmatmul.mubr.bf16.vlgmr.msra.gmra.mxu1 %v2732_v3  ;;  %1297 = vmatprep.mubr.bf16.mxu0 %v2748_v26  ;;  %v2444_v3 = vld [vmem:[#allocation5 + $0x58] sm:$0xff]   ;;  %v2446_v26 = vld [vmem:[#allocation5 + $0x50] sm:$0xff]  }
 0x134   :  { %2107 = vmatprep.mubr.msk.bf16.mxu1 %vm1006_vm2, %v2745_v25  ;;  %2208 = vmatpush3.bf16.msra.mxu0 %v2437_v43  ;;  %v2445_v25 = vld [vmem:[#allocation5 + $0x18] sm:$0xff]  }
 0x135   :  { %2312 = vmatpush3.bf16.msra.mxu1 %v2437_v43  ;;  %2209 = vmatprep.subr.bf16.mxu0 %v2438_v45 }
 0x136   :  { %2305 = vmatprep.subr.bf16.mxu1 %v2438_v45 }
 0x138   :  { %2210 = vmatpush3.bf16.msra.mxu0 %v2439_v48 }
 0x139   :  { %2313 = vmatpush3.bf16.msra.mxu1 %v2439_v48  ;;  %2211 = vmatprep.subr.bf16.mxu0 %v2440_v49 }
 0x13a   :  { %2306 = vmatprep.subr.bf16.mxu1 %v2440_v49  ;;  %1298 = vmatmul.mubr.bf16.gmra.mxu0 %v2751_v31  ;;  %v2447_v31 = vld [vmem:[#allocation5 + $0x10] sm:$0xff]  }
 0x13b   :  { %1395 = vmatmul.mubr.bf16.gmra.mxu1 %v2754_v32  ;;  %1305 = vmatprep.mubr.bf16.mxu0 %v2771_v57  ;;  %v2448_v32 = vld [vmem:[#allocation5 + $0x48] sm:$0xff]   ;;  %v2450_v57 = vld [vmem:[#allocation5 + $0x40] sm:$0xff]  }
 0x13c   :  { %2108 = vmatprep.mubr.msk.bf16.mxu1 %vm1006_vm2, %v2768_v56  ;;  %2212 = vmatpush3.bf16.msra.mxu0 %v2441_v63  ;;  %v2449_v56 = vld [vmem:[#allocation5 + $0x8] sm:$0xff]  }
 0x13d   :  { %2314 = vmatpush3.bf16.msra.mxu1 %v2441_v63  ;;  %2213 = vmatprep.subr.bf16.mxu0 %v2442_v62 }
 0x13e   :  { %2307 = vmatprep.subr.bf16.mxu1 %v2442_v62 }
 0x140   :  { %2214 = vmatpush3.bf16.msra.mxu0 %v2443_v2 }
 0x141   :  { %2315 = vmatpush3.bf16.msra.mxu1 %v2443_v2  ;;  %2215 = vmatprep.subr.bf16.mxu0 %v2444_v3 }
 0x142   :  { %2308 = vmatprep.subr.bf16.mxu1 %v2444_v3  ;;  %1306 = vmatmul.mubr.bf16.gmra.mxu0 %v2774_v61  ;;  %v2451_v61 = vld [vmem:[#allocation5] sm:$0xff]  }
 0x143   :  { %1403 = vmatmul.mubr.bf16.gmra.mxu1 %v2777_v1  ;;  %1313 = vmatprep.mubr.bf16.mxu0 %v2793_v23  ;;  %v2452_v1 = vld [vmem:[#allocation5 + $0x90] sm:$0x3f]   ;;  %v2114_v23 = vld.sshfl [vmem:[%s3065_s4] sm:$0x13 pattern:$0x75316420] }
 0x144   :  { %2109 = vmatprep.mubr.msk.bf16.mxu1 %vm1006_vm2, %v2790_v22  ;;  %2216 = vmatpush3.bf16.msra.mxu0 %v2445_v25  ;;  %v2934_v22 = vsel %vm1752_vm3, %v2452_v1, 0 }
 0x145   :  { %2316 = vmatpush3.bf16.msra.mxu1 %v2445_v25  ;;  %2217 = vmatprep.subr.bf16.mxu0 %v2446_v26 }
 0x146   :  { %2309 = vmatprep.subr.bf16.mxu1 %v2446_v26 }
 0x148   :  { %2218 = vmatpush3.bf16.msra.mxu0 %v2447_v31 }
 0x149   :  { %2317 = vmatpush3.bf16.msra.mxu1 %v2447_v31  ;;  %2219 = vmatprep.subr.bf16.mxu0 %v2448_v32 }
 0x14a   :  { %2310 = vmatprep.subr.bf16.mxu1 %v2448_v32  ;;  %1314 = vmatmul.mubr.bf16.gmra.mxu0 %v2796_v30  ;;  %v1484_v30 = vcombine.high %v2114_v23, %v2114_v23 }
 0x14b   :  { %1411 = vmatmul.mubr.bf16.gmra.mxu1 %v2799_v33  ;;  %1321 = vmatprep.mubr.bf16.mxu0 %v2816_v60  ;;  %v2940_v33 = vrot.slane %v2114_v23, %v2700_v27 }
 0x14c   :  { %2110 = vmatprep.mubr.msk.bf16.mxu1 %vm1006_vm2, %v2813_v59  ;;  %2220 = vmatpush3.bf16.msra.mxu0 %v2449_v56  ;;  %v1498_v59 = vrot.slane %v1484_v30, %v2700_v27 }
 0x14d   :  { %2318 = vmatpush3.bf16.msra.mxu1 %v2449_v56  ;;  %2221 = vmatprep.subr.bf16.mxu0 %v2450_v57 }
 0x14e   :  { %2311 = vmatprep.subr.bf16.mxu1 %v2450_v57 }
 0x150   :  { %2222 = vmatpush3.bf16.msra.mxu0 %v2451_v61 }
 0x151   :  { %2319 = vmatpush3.bf16.msra.mxu1 %v2451_v61 }
 0x152   :  { %1322 = vmatmul.mubr.bf16.gmra.mxu0 %v2819_v7  ;;  %2320 = vmatprep.subr.msk.bf16.mxu1 %vm1752_vm3, %v2452_v1 }
 0x153   :  { %1419 = vmatmul.mubr.bf16.gmra.mxu1 %v2822_v8  ;;  %1329 = vmatprep.mubr.bf16.mxu0 %v2839_v37  ;;  %v1501_v37 = vpack.i.b16 %v2940_v33, %v2940_v33 }
 0x154   :  { %2111 = vmatprep.mubr.msk.bf16.mxu1 %vm1006_vm2, %v2836_v35 }
 0x155   :  { %v2946_v50 = vrot.slane %v1501_v37, %v2704_v36 }
 0x15a   :  { %1330 = vmatmul.mubr.bf16.gmra.mxu0 %v2842_v40  ;;  %v1508_v40 = vpack.i.b16 %v1498_v59, %v1498_v59 }
 0x15b   :  { %1427 = vmatmul.mubr.bf16.gmra.mxu1 %v2845_v41  ;;  %1337 = vmatprep.mubr.bf16.mxu0 %v2860_v10 }
 0x15c   :  { %2112 = vmatprep.mubr.msk.bf16.mxu1 %vm1006_vm2, %v2857_v9  ;;  %v2949_v55 = vrot.slane %v1508_v40, %v2704_v36 }
 0x162   :  { %1338 = vmatmul.mubr.bf16.gmra.mxu0 %v2863_v13 }
 0x163   :  { %1435 = vmatmul.mubr.bf16.gmra.mxu1 %v2866_v14  ;;  %1345 = vmatprep.mubr.bf16.mxu0 %v2881_v38 }
 0x164   :  { %2113 = vmatprep.mubr.msk.bf16.mxu1 %vm1006_vm2, %v2878_v34 }
 0x16a   :  { %1346 = vmatmul.mubr.bf16.gmra.mxu0 %v2884_v39 }
 0x16b   :  { %1443 = vmatmul.mubr.bf16.gmra.mxu1 %v2887_v42 }
 0x1b2   :  { %v1065_v60 = vpop.f32.mrf.mxu0 }
 0x1b3   :  { %v1178_v7 = vpop.f32.mrf.mxu1 }
 0x1b4   :  { %v1067_v8 = vpop.f32.mrf.mxu0  ;;  %v1179_v46 = vadd.f32 %v1178_v7, %v1065_v60 }
 0x1b5   :  { %v1180_v35 = vpop.f32.mrf.mxu1 }
 0x1b6   :  { %v1069_v41 = vpop.f32.mrf.mxu0  ;;  %v1181_v53 = vadd.f32 %v1180_v35, %v1067_v8 }
 0x1b7   :  { %v1182_v44 = vpop.f32.mrf.mxu1 }
 0x1b8   :  { %v1183_v47 = vadd.f32 %v1182_v44, %v1069_v41  ;;  %v1071_v51 = vpop.f32.mrf.mxu0 }
 0x1b9   :  { %v1184_v52 = vpop.f32.mrf.mxu1 }
 0x1ba   :  { %v1451_v54 = vpack.c.bf16 %v1183_v47, %v1179_v46  ;;  %v1185_v27 = vadd.f32 %v1184_v52, %v1071_v51  ;;  %v1075_v58 = vpop.f32.mrf.mxu0 }
 0x1bb   :  { %v1188_v4 = vpop.f32.mrf.mxu1 }
 0x1bc   :  { %v1452_v5 = vpack.c.bf16 %v1185_v27, %v1181_v53  ;;  %v1521_v6 = vadd.bf16 %v2946_v50, %v1451_v54  ;;  %v1077_v9 = vpop.f32.mrf.mxu0  ;;  %v1189_v14 = vadd.f32 %v1188_v4, %v1075_v58 }
 0x1bd   :  { %v1190_v10 = vpop.f32.mrf.mxu1 }
 0x1be   :  { %v1522_v11 = vadd.bf16 %v2949_v55, %v1452_v5  ;;  %v1079_v12 = vpop.f32.mrf.mxu0  ;;  %v1545_v17 = vmax.bf16 %v2559_v0, %v1521_v6  ;;  %v1191_v20 = vadd.f32 %v1190_v10, %v1077_v9 }
 0x1bf   :  { %v1192_v13 = vpop.f32.mrf.mxu1 }
 0x1c0   :  { %v1193_v15 = vadd.f32 %v1192_v13, %v1079_v12  ;;  %v1546_v16 = vmax.bf16 %v2559_v0, %v1522_v11  ;;  %v1081_v18 = vpop.f32.mrf.mxu0 }
 0x1c1   :  { %v1194_v19 = vpop.f32.mrf.mxu1 }
 0x1c2   :  { %v1454_v21 = vpack.c.bf16 %v1193_v15, %v1189_v14  ;;  %v1195_v24 = vadd.f32 %v1194_v19, %v1081_v18  ;;  %1788 = vmatprep.mubr.bf16.mxu0 %v1546_v16  ;;  %v1085_v28 = vpop.f32.mrf.mxu0 }
 0x1c3   :  { %v1198_v29 = vpop.f32.mrf.mxu1  ;;  %1789 = vmatmul.mubr.bf16.vlgmr.msra.gmra.mxu0 %v1545_v17 }
 0x1c4   :  { %v1455_v34 = vpack.c.bf16 %v1195_v24, %v1191_v20  ;;  %v1524_v38 = vadd.bf16 %v2946_v50, %v1454_v21  ;;  %v1087_v39 = vpop.f32.mrf.mxu0  ;;  %v1199_v49 = vadd.f32 %v1198_v29, %v1085_v28 }
 0x1c5   :  { %v1200_v42 = vpop.f32.mrf.mxu1 }
 0x1c6   :  { %v1525_v43 = vadd.bf16 %v2949_v55, %v1455_v34  ;;  %v1089_v45 = vpop.f32.mrf.mxu0  ;;  %v1548_v25 = vmax.bf16 %v2559_v0, %v1524_v38  ;;  %v1201_v26 = vadd.f32 %v1200_v42, %v1087_v39 }
 0x1c7   :  { %v1202_v48 = vpop.f32.mrf.mxu1 }
 0x1c8   :  { %v1203_v63 = vadd.f32 %v1202_v48, %v1089_v45  ;;  %v1549_v62 = vmax.bf16 %v2559_v0, %v1525_v43  ;;  %v1091_v2 = vpop.f32.mrf.mxu0 }
 0x1c9   :  { %v1204_v3 = vpop.f32.mrf.mxu1 }
 0x1ca   :  { %v1457_v31 = vpack.c.bf16 %v1203_v63, %v1199_v49  ;;  %v1205_v32 = vadd.f32 %v1204_v3, %v1091_v2  ;;  %1796 = vmatprep.mubr.bf16.mxu0 %v1549_v62  ;;  %v1095_v56 = vpop.f32.mrf.mxu0 }
 0x1cb   :  { %v1208_v57 = vpop.f32.mrf.mxu1  ;;  %1797 = vmatmul.mubr.bf16.gmra.mxu0 %v1548_v25 }
 0x1cc   :  { %v1458_v61 = vpack.c.bf16 %v1205_v32, %v1201_v26  ;;  %v1527_v1 = vadd.bf16 %v2946_v50, %v1457_v31  ;;  %v1097_v23 = vpop.f32.mrf.mxu0  ;;  %v1209_v8 = vadd.f32 %v1208_v57, %v1095_v56 }
 0x1cd   :  { %v1210_v30 = vpop.f32.mrf.mxu1 }
 0x1ce   :  { %v1528_v59 = vadd.bf16 %v2949_v55, %v1458_v61  ;;  %v1099_v60 = vpop.f32.mrf.mxu0  ;;  %v1551_v44 = vmax.bf16 %v2559_v0, %v1527_v1  ;;  %v1211_v46 = vadd.f32 %v1210_v30, %v1097_v23 }
 0x1cf   :  { %v1212_v7 = vpop.f32.mrf.mxu1 }
 0x1d0   :  { %v1213_v35 = vadd.f32 %v1212_v7, %v1099_v60  ;;  %v1552_v37 = vmax.bf16 %v2559_v0, %v1528_v59  ;;  %v1101_v40 = vpop.f32.mrf.mxu0 }
 0x1d1   :  { %v1214_v41 = vpop.f32.mrf.mxu1 }
 0x1d2   :  { %v1460_v47 = vpack.c.bf16 %v1213_v35, %v1209_v8  ;;  %v1215_v51 = vadd.f32 %v1214_v41, %v1101_v40  ;;  %1804 = vmatprep.mubr.bf16.mxu0 %v1552_v37  ;;  %v1105_v52 = vpop.f32.mrf.mxu0 }
 0x1d3   :  { %v1218_v53 = vpop.f32.mrf.mxu1  ;;  %1805 = vmatmul.mubr.bf16.gmra.mxu0 %v1551_v44 }
 0x1d4   :  { %v1461_v54 = vpack.c.bf16 %v1215_v51, %v1211_v46  ;;  %v1530_v27 = vadd.bf16 %v2946_v50, %v1460_v47  ;;  %v1107_v58 = vpop.f32.mrf.mxu0  ;;  %v1219_v10 = vadd.f32 %v1218_v53, %v1105_v52 }
 0x1d5   :  { %v1220_v4 = vpop.f32.mrf.mxu1 }
 0x1d6   :  { %v1531_v5 = vadd.bf16 %v2949_v55, %v1461_v54  ;;  %v1109_v6 = vpop.f32.mrf.mxu0  ;;  %v1554_v15 = vmax.bf16 %v2559_v0, %v1530_v27  ;;  %v1221_v16 = vadd.f32 %v1220_v4, %v1107_v58 }
 0x1d7   :  { %v1222_v9 = vpop.f32.mrf.mxu1 }
 0x1d8   :  { %v1223_v11 = vadd.f32 %v1222_v9, %v1109_v6  ;;  %v1555_v12 = vmax.bf16 %v2559_v0, %v1531_v5  ;;  %v1111_v13 = vpop.f32.mrf.mxu0 }
 0x1d9   :  { %v1224_v14 = vpop.f32.mrf.mxu1 }
 0x1da   :  { %v1463_v17 = vpack.c.bf16 %v1223_v11, %v1219_v10  ;;  %v1225_v18 = vadd.f32 %v1224_v14, %v1111_v13  ;;  %1812 = vmatprep.mubr.bf16.mxu0 %v1555_v12  ;;  %v1115_v19 = vpop.f32.mrf.mxu0  ;;  %v2453_v12 = vld [vmem:[#allocation5 + $0x88] sm:$0xff]  }
 0x1db   :  { %v1228_v20 = vpop.f32.mrf.mxu1  ;;  %1813 = vmatmul.mubr.bf16.gmra.mxu0 %v1554_v15 }
 0x1dc   :  { %v1464_v21 = vpack.c.bf16 %v1225_v18, %v1221_v16  ;;  %v1533_v24 = vadd.bf16 %v2946_v50, %v1463_v17  ;;  %v1117_v28 = vpop.f32.mrf.mxu0  ;;  %v1229_v42 = vadd.f32 %v1228_v20, %v1115_v19  ;;  %v1499_v19 = vcombine.high %v2940_v33, %v2940_v33 }
 0x1dd   :  { %v1230_v29 = vpop.f32.mrf.mxu1 }
 0x1de   :  { %v1534_v34 = vadd.bf16 %v2949_v55, %v1464_v21  ;;  %v1119_v38 = vpop.f32.mrf.mxu0  ;;  %v1557_v48 = vmax.bf16 %v2559_v0, %v1533_v24  ;;  %v1231_v62 = vadd.f32 %v1230_v29, %v1117_v28  ;;  %v2454_v28 = vld [vmem:[#allocation5 + $0x80] sm:$0xff]  }
 0x1df   :  { %v1232_v39 = vpop.f32.mrf.mxu1 }
 0x1e0   :  { %v1233_v43 = vadd.f32 %v1232_v39, %v1119_v38  ;;  %v1558_v45 = vmax.bf16 %v2559_v0, %v1534_v34  ;;  %v1121_v49 = vpop.f32.mrf.mxu0 }
 0x1e1   :  { %v1234_v63 = vpop.f32.mrf.mxu1 }
 0x1e2   :  { %v1466_v2 = vpack.c.bf16 %v1233_v43, %v1229_v42  ;;  %v1235_v3 = vadd.f32 %v1234_v63, %v1121_v49  ;;  %1820 = vmatprep.mubr.bf16.mxu0 %v1558_v45  ;;  %v1125_v25 = vpop.f32.mrf.mxu0  ;;  %v1515_v42 = vpack.i.b16 %v1499_v19, %v1499_v19 }
 0x1e3   :  { %v1238_v26 = vpop.f32.mrf.mxu1  ;;  %1821 = vmatmul.mubr.bf16.gmra.mxu0 %v1557_v48 }
 0x1e4   :  { %v1467_v31 = vpack.c.bf16 %v1235_v3, %v1231_v62  ;;  %v1536_v32 = vadd.bf16 %v2946_v50, %v1466_v2  ;;  %v1127_v56 = vpop.f32.mrf.mxu0  ;;  %v1239_v30 = vadd.f32 %v1238_v26, %v1125_v25 }
 0x1e5   :  { %v1240_v57 = vpop.f32.mrf.mxu1 }
 0x1e6   :  { %v1537_v61 = vadd.bf16 %v2949_v55, %v1467_v31  ;;  %v1129_v1 = vpop.f32.mrf.mxu0  ;;  %v1560_v7 = vmax.bf16 %v2559_v0, %v1536_v32  ;;  %v1241_v37 = vadd.f32 %v1240_v57, %v1127_v56 }
 0x1e7   :  { %v1242_v23 = vpop.f32.mrf.mxu1 }
 0x1e8   :  { %v1243_v59 = vadd.f32 %v1242_v23, %v1129_v1  ;;  %v1561_v60 = vmax.bf16 %v2559_v0, %v1537_v61  ;;  %v1131_v8 = vpop.f32.mrf.mxu0 }
 0x1e9   :  { %v1244_v35 = vpop.f32.mrf.mxu1 }
 0x1ea   :  { %v1469_v40 = vpack.c.bf16 %v1243_v59, %v1239_v30  ;;  %v1245_v41 = vadd.f32 %v1244_v35, %v1131_v8  ;;  %1828 = vmatprep.mubr.bf16.mxu0 %v1561_v60  ;;  %v1135_v44 = vpop.f32.mrf.mxu0 }
 0x1eb   :  { %v1248_v46 = vpop.f32.mrf.mxu1  ;;  %1829 = vmatmul.mubr.bf16.gmra.mxu0 %v1560_v7 }
 0x1ec   :  { %v1470_v47 = vpack.c.bf16 %v1245_v41, %v1241_v37  ;;  %v1539_v51 = vadd.bf16 %v2946_v50, %v1469_v40  ;;  %v1137_v52 = vpop.f32.mrf.mxu0  ;;  %v1249_v4 = vadd.f32 %v1248_v46, %v1135_v44 }
 0x1ed   :  { %v1250_v53 = vpop.f32.mrf.mxu1 }
 0x1ee   :  { %v1540_v54 = vadd.bf16 %v2949_v55, %v1470_v47  ;;  %v1139_v27 = vpop.f32.mrf.mxu0  ;;  %v1563_v9 = vmax.bf16 %v2559_v0, %v1539_v51  ;;  %v1251_v13 = vadd.f32 %v1250_v53, %v1137_v52 }
 0x1ef   :  { %v1252_v58 = vpop.f32.mrf.mxu1 }
 0x1f0   :  { %v1253_v5 = vadd.f32 %v1252_v58, %v1139_v27  ;;  %v1564_v6 = vmax.bf16 %v2559_v0, %v1540_v54  ;;  %v1141_v10 = vpop.f32.mrf.mxu0 }
 0x1f1   :  { %v1254_v11 = vpop.f32.mrf.mxu1 }
 0x1f2   :  { %v1472_v14 = vpack.c.bf16 %v1253_v5, %v1249_v4  ;;  %v1255_v15 = vadd.f32 %v1254_v11, %v1141_v10  ;;  %1836 = vmatprep.mubr.bf16.mxu1 %v1564_v6  ;;  %v2159_v16 = vpop.f32.mrf.mxu0 }
 0x1f3   :  { %v1388_v17 = vpop.f32.mrf.mxu1  ;;  %1837 = vmatmul.mubr.bf16.vlgmr.msra.gmra.mxu1 %v1563_v9 }
 0x1f4   :  { %v1473_v18 = vpack.c.bf16 %v1255_v15, %v1251_v13  ;;  %2283 = vmatpush3.bf16.msra.mxu1 %v2934_v22  ;;  %v1542_v20 = vadd.bf16 %v2946_v50, %v1472_v14  ;;  %v2160_v21 = vpop.f32.mrf.mxu0 }
 0x1f5   :  { %v1390_v24 = vpop.f32.mrf.mxu1  ;;  %2284 = vmatprep.subr.bf16.mxu1 %v2453_v12  ;;  %v2161_v39 = vadd.f32 %v2160_v21, %v2159_v16 }
 0x1f6   :  { %v1543_v29 = vadd.bf16 %v2949_v55, %v1473_v18  ;;  %v2162_v34 = vpop.f32.mrf.mxu0  ;;  %v1566_v33 = vmax.bf16 %v2559_v0, %v1542_v20  ;;  %v2987_v55 = vrot.slane %v1515_v42, %v2704_v36 }
 0x1f7   :  { %v1391_v38 = vpop.f32.mrf.mxu1  ;;  %v1389_v63 = vadd.f32 %v2161_v39, %v1388_v17 }
 0x1f8   :  { %v1567_v43 = vmax.bf16 %v2559_v0, %v1543_v29  ;;  %2285 = vmatpush3.bf16.msra.mxu1 %v2453_v12  ;;  %v2163_v45 = vpop.f32.mrf.mxu0 }
 0x1f9   :  { %v1393_v48 = vpop.f32.mrf.mxu1  ;;  %2286 = vmatprep.subr.bf16.mxu1 %v2454_v28  ;;  %v2164_v22 = vadd.f32 %v2163_v45, %v2162_v34 }
 0x1fa   :  { %1844 = vmatprep.mubr.bf16.mxu1 %v1567_v43  ;;  %v2165_v50 = vpop.f32.mrf.mxu0 }
 0x1fb   :  { %v1396_v49 = vpop.f32.mrf.mxu1  ;;  %1845 = vmatmul.mubr.bf16.gmra.mxu1 %v1566_v33  ;;  %v1392_v62 = vadd.f32 %v2164_v22, %v1391_v38 }
 0x1fc   :  { %2287 = vmatpush3.bf16.msra.mxu1 %v2454_v28  ;;  %v2166_v2 = vpop.f32.mrf.mxu0 }
 0x1fd   :  { %v1398_v3 = vpop.f32.mrf.mxu1  ;;  %v1453_v25 = vpack.c.bf16 %v1392_v62, %v1389_v63  ;;  %v2167_v56 = vadd.f32 %v2166_v2, %v2165_v50 }
 0x1fe   :  { %v2168_v26 = vpop.f32.mrf.mxu0 }
 0x1ff   :  { %v1399_v31 = vpop.f32.mrf.mxu1  ;;  %v1523_v32 = vadd.bf16 %v2987_v55, %v1453_v25  ;;  %v1397_v60 = vadd.f32 %v2167_v56, %v1396_v49 }
 0x200   :  { %v2169_v57 = vpop.f32.mrf.mxu0 }
 0x201   :  { %v1401_v61 = vpop.f32.mrf.mxu1  ;;  %v2170_v1 = vadd.f32 %v2169_v57, %v2168_v26  ;;  %v1547_v23 = vmax.bf16 %v2559_v0, %v1523_v32 }
 0x202   :  { %v2171_v30 = vpop.f32.mrf.mxu0 }
 0x203   :  { %v1404_v59 = vpop.f32.mrf.mxu1  ;;  %v1400_v36 = vadd.f32 %v2170_v1, %v1399_v31  ;;  %2288 = vmatprep.mubr.msk.bf16.mxu1 %vm1727_vm4, %v1547_v23 }
 0x204   :  { %v2172_v7 = vpop.f32.mrf.mxu0 }
 0x205   :  { %v1406_v8 = vpop.f32.mrf.mxu1  ;;  %v1456_v35 = vpack.c.bf16 %v1400_v36, %v1397_v60  ;;  %v2173_v44 = vadd.f32 %v2172_v7, %v2171_v30 }
 0x206   :  { %v2174_v37 = vpop.f32.mrf.mxu0 }
 0x207   :  { %v1407_v40 = vpop.f32.mrf.mxu1  ;;  %v1526_v41 = vadd.bf16 %v2987_v55, %v1456_v35  ;;  %v1405_v27 = vadd.f32 %v2173_v44, %v1404_v59 }
 0x208   :  { %v2175_v46 = vpop.f32.mrf.mxu0 }
 0x209   :  { %v1409_v47 = vpop.f32.mrf.mxu1  ;;  %v1550_v51 = vmax.bf16 %v2559_v0, %v1526_v41  ;;  %v2176_v52 = vadd.f32 %v2175_v46, %v2174_v37 }
 0x20a   :  { %v2177_v53 = vpop.f32.mrf.mxu0 }
 0x20b   :  { %v1412_v54 = vpop.f32.mrf.mxu1  ;;  %v1408_v58 = vadd.f32 %v2176_v52, %v1407_v40  ;;  %2289 = vmatmul.mubr.msk.bf16.vlgmr.msra.gmra.mxu1 %vm1727_vm4, %v1550_v51 }
 0x20c   :  { %v2178_v4 = vpop.f32.mrf.mxu0 }
 0x20d   :  { %v1414_v5 = vpop.f32.mrf.mxu1  ;;  %v1459_v6 = vpack.c.bf16 %v1408_v58, %v1405_v27  ;;  %v2179_v12 = vadd.f32 %v2178_v4, %v2177_v53 }
 0x20e   :  { %v2180_v9 = vpop.f32.mrf.mxu0 }
 0x20f   :  { %v1415_v10 = vpop.f32.mrf.mxu1  ;;  %v1529_v11 = vadd.bf16 %v2987_v55, %v1459_v6  ;;  %v1413_v19 = vadd.f32 %v2179_v12, %v1412_v54 }
 0x210   :  { %v2181_v13 = vpop.f32.mrf.mxu0 }
 0x211   :  { %v1417_v14 = vpop.f32.mrf.mxu1  ;;  %v2182_v15 = vadd.f32 %v2181_v13, %v2180_v9  ;;  %v1553_v16 = vmax.bf16 %v2559_v0, %v1529_v11 }
 0x212   :  { %v2183_v17 = vpop.f32.mrf.mxu0 }
 0x213   :  { %v1420_v18 = vpop.f32.mrf.mxu1  ;;  %v1416_v20 = vadd.f32 %v2182_v15, %v1415_v10  ;;  %2292 = vmatprep.mubr.msk.bf16.mxu1 %vm1727_vm4, %v1553_v16 }
 0x214   :  { %v2184_v21 = vpop.f32.mrf.mxu0 }
 0x215   :  { %v1422_v24 = vpop.f32.mrf.mxu1  ;;  %v1462_v28 = vpack.c.bf16 %v1416_v20, %v1413_v19  ;;  %v2185_v39 = vadd.f32 %v2184_v21, %v2183_v17 }
 0x216   :  { %v2186_v29 = vpop.f32.mrf.mxu0 }
 0x217   :  { %v1423_v34 = vpop.f32.mrf.mxu1  ;;  %v1532_v38 = vadd.bf16 %v2987_v55, %v1462_v28  ;;  %v1421_v50 = vadd.f32 %v2185_v39, %v1420_v18 }
 0x218   :  { %v2187_v42 = vpop.f32.mrf.mxu0 }
 0x219   :  { %v1425_v43 = vpop.f32.mrf.mxu1  ;;  %v2188_v45 = vadd.f32 %v2187_v42, %v2186_v29  ;;  %v1556_v48 = vmax.bf16 %v2559_v0, %v1532_v38 }
 0x21a   :  { %v2189_v33 = vpop.f32.mrf.mxu0 }
 0x21b   :  { %v1428_v22 = vpop.f32.mrf.mxu1  ;;  %v1424_v49 = vadd.f32 %v2188_v45, %v1423_v34  ;;  %2293 = vmatmul.mubr.msk.bf16.gmra.mxu1 %vm1727_vm4, %v1556_v48 }
 0x21c   :  { %v2190_v63 = vpop.f32.mrf.mxu0 }
 0x21d   :  { %v1430_v62 = vpop.f32.mrf.mxu1  ;;  %v1465_v2 = vpack.c.bf16 %v1424_v49, %v1421_v50  ;;  %v2191_v31 = vadd.f32 %v2190_v63, %v2189_v33 }
 0x21e   :  { %v2192_v3 = vpop.f32.mrf.mxu0 }
 0x21f   :  { %v1431_v25 = vpop.f32.mrf.mxu1  ;;  %v1535_v26 = vadd.bf16 %v2987_v55, %v1465_v2  ;;  %v1429_v30 = vadd.f32 %v2191_v31, %v1428_v22 }
 0x220   :  { %v2193_v32 = vpop.f32.mrf.mxu0 }
 0x221   :  { %v1433_v56 = vpop.f32.mrf.mxu1  ;;  %v2194_v57 = vadd.f32 %v2193_v32, %v2192_v3  ;;  %v1559_v61 = vmax.bf16 %v2559_v0, %v1535_v26 }
 0x222   :  { %v2195_v1 = vpop.f32.mrf.mxu0  ;;  %v3032_v56 = vld [vmem:[%s3067_s6] ss:$0 sm:$0xff]  ;;  %s2561_s6 = smov [#allocation7]  }
 0x223   :  { %v1436_v23 = vpop.f32.mrf.mxu1  ;;  %v1432_v59 = vadd.f32 %v2194_v57, %v1431_v25  ;;  %2296 = vmatprep.mubr.msk.bf16.mxu1 %vm1727_vm4, %v1559_v61  ;;  %s1987_s25 = sshll.u32 %s2561_s6, 4  ;;  %s1988_s25 = int_to_ptr.vmem [resolvable:$true] %s1987_s25 }
 0x224   :  { %v2196_v60 = vpop.f32.mrf.mxu0  ;;  %s2527_s26 = scalar_lea.vmem %s1988_s25, 2048  ;;  %p2532_p11 = scmp.lt.s32.totalorder %s1988_s25, %s1988_s25 }
 0x225   :  { %v1438_v36 = vpop.f32.mrf.mxu1  ;;  %v1468_v7 = vpack.c.bf16 %v1432_v59, %v1429_v30  ;;  %v2197_v40 = vadd.f32 %v2196_v60, %v2195_v1  ;;  %p2528_p10 = scmp.ne.s32.totalorder %s1988_s25, %s2527_s26  ;;  %p2533_p12 = scmp.lt.s32.totalorder %s2527_s26, %s2527_s26 }
 0x226   :  { %v2198_v8 = vpop.f32.mrf.mxu0 }
 0x227   :  { %v1439_v35 = vpop.f32.mrf.mxu1  ;;  %v1538_v37 = vadd.bf16 %v2987_v55, %v1468_v7  ;;  %v1437_v53 = vadd.f32 %v2197_v40, %v1436_v23  ;;  %p2534_p13 = por %p2533_p12, %p2532_p11 }
 0x228   :  { %v2199_v41 = vpop.f32.mrf.mxu0 }
 0x229   :  { %v1441_v44 = vpop.f32.mrf.mxu1  ;;  %v1562_v46 = vmax.bf16 %v2559_v0, %v1538_v37  ;;  %v2200_v47 = vadd.f32 %v2199_v41, %v2198_v8  ;;  %p2535_p0 = pnand %p2534_p13, %p2528_p10 }
 0x22a   :  { %v2201_v51 = vpop.f32.mrf.mxu0 }
 0x22b   :  { %v1444_v52 = vpop.f32.mrf.mxu1  ;;  %v1440_v54 = vadd.f32 %v2200_v47, %v1439_v35  ;;  %2297 = vmatmul.mubr.msk.bf16.gmra.mxu1 %vm1727_vm4, %v1562_v46 }
 0x22c   :  { %v2202_v27 = vpop.f32.mrf.mxu0 }
 0x22d   :  { %v1446_v58 = vpop.f32.mrf.mxu1  ;;  %v1471_v4 = vpack.c.bf16 %v1440_v54, %v1437_v53  ;;  %v2203_v10 = vadd.f32 %v2202_v27, %v2201_v51 }
 0x22e   :  { %v2204_v5 = vpop.f32.mrf.mxu0 }
 0x22f   :  { %v1447_v6 = vpop.f32.mrf.mxu1  ;;  %v1541_v9 = vadd.bf16 %v2987_v55, %v1471_v4  ;;  %v1445_v15 = vadd.f32 %v2203_v10, %v1444_v52 }
 0x230   :  { %v2205_v11 = vpop.f32.mrf.mxu0 }
 0x231   :  { %v1449_v12 = vpop.f32.mrf.mxu1  ;;  %v2206_v13 = vadd.f32 %v2205_v11, %v2204_v5  ;;  %v1565_v14 = vmax.bf16 %v2559_v0, %v1541_v9 }
 0x233   :  { %v1448_v16 = vadd.f32 %v2206_v13, %v1447_v6  ;;  %2300 = vmatprep.mubr.msk.bf16.mxu1 %vm1727_vm4, %v1565_v14 }
 0x235   :  { %v1474_v17 = vpack.c.bf16 %v1448_v16, %v1445_v15 }
 0x237   :  { %v1544_v18 = vadd.bf16 %v2987_v55, %v1474_v17 }
 0x239   :  { %v1568_v19 = vmax.bf16 %v2559_v0, %v1544_v18 }
 0x23b   :  { %2301 = vmatmul.mubr.msk.bf16.gmra.mxu1 %vm1727_vm4, %v1568_v19 }
 0x283   :  { %v2223_v20 = vpop.f32.mrf.mxu0 }
 0x285   :  { %v2224_v21 = vpop.f32.mrf.mxu0 }
 0x286   :  { %v2225_v31 = vadd.f32 %v2224_v21, %v2223_v20 }
 0x287   :  { %v2226_v24 = vpop.f32.mrf.mxu0 }
 0x288   :  { %v1791_v60 = vadd.f32 %v2225_v31, %v3032_v56 }
 0x289   :  { %v2227_v28 = vpop.f32.mrf.mxu0 }
 0x28a   :  { %v2228_v30 = vadd.f32 %v2227_v28, %v2226_v24 }
 0x28b   :  { %v2229_v29 = vpop.f32.mrf.mxu0 }
 0x28c   :  { %v1794_v41 = vadd.f32 %v2228_v30, %v3032_v56 }
 0x28d   :  { %v2230_v34 = vpop.f32.mrf.mxu0 }
 0x28e   :  { %v2231_v25 = vadd.f32 %v2230_v34, %v2229_v29 }
 0x28f   :  { %v2232_v38 = vpop.f32.mrf.mxu0 }
 0x290   :  { %v1799_v61 = vadd.f32 %v2231_v25, %v3032_v56 }
 0x291   :  { %v2233_v39 = vpop.f32.mrf.mxu0 }
 0x292   :  { %v2234_v57 = vadd.f32 %v2233_v39, %v2232_v38 }
 0x293   :  { %v2235_v42 = vpop.f32.mrf.mxu0 }
 0x294   :  { %v1802_v8 = vadd.f32 %v2234_v57, %v3032_v56 }
 0x295   :  { %v2236_v43 = vpop.f32.mrf.mxu0 }
 0x296   :  { %v2237_v53 = vadd.f32 %v2236_v43, %v2235_v42 }
 0x297   :  { %v2238_v48 = vpop.f32.mrf.mxu0 }
 0x298   :  { %v1807_v10 = vadd.f32 %v2237_v53, %v3032_v56 }
 0x299   :  { %v2239_v0 = vpop.f32.mrf.mxu0 }
 0x29a   :  { %v2240_v6 = vadd.f32 %v2239_v0, %v2238_v48 }
 0x29b   :  { %v2241_v50 = vpop.f32.mrf.mxu0 }
 0x29c   :  { %v1810_v19 = vadd.f32 %v2240_v6, %v3032_v56 }
 0x29d   :  { %v2242_v63 = vpop.f32.mrf.mxu0 }
 0x29e   :  { %v2243_v51 = vadd.f32 %v2242_v63, %v2241_v50 }
 0x29f   :  { %v2244_v2 = vpop.f32.mrf.mxu0 }
 0x2a0   :  { %v1815_v27 = vadd.f32 %v2243_v51, %v3032_v56 }
 0x2a1   :  { %v2245_v26 = vpop.f32.mrf.mxu0 }
 0x2a2   :  { %v2246_v54 = vadd.f32 %v2245_v26, %v2244_v2 }
 0x2a3   :  { %v2247_v1 = vpop.f32.mrf.mxu0 }
 0x2a4   :  { %v1818_v14 = vadd.f32 %v2246_v54, %v3032_v56 }
 0x2a5   :  { %v2248_v35 = vpop.f32.mrf.mxu0 }
 0x2a6   :  { %v2249_v38 = vadd.f32 %v2248_v35, %v2247_v1 }
 0x2a7   :  { %v2250_v47 = vpop.f32.mrf.mxu0 }
 0x2a8   :  { %v1823_v63 = vadd.f32 %v2249_v38, %v3032_v56 }
 0x2a9   :  { %v2251_v52 = vpop.f32.mrf.mxu0 }
 0x2aa   :  { %v2252_v0 = vadd.f32 %v2251_v52, %v2250_v47 }
 0x2ab   :  { %v2253_v4 = vpop.f32.mrf.mxu0 }
 0x2ad   :  { %v2254_v16 = vpop.f32.mrf.mxu0 }
 0x2ae   :  { %v2255_v29 = vadd.f32 %v2254_v16, %v2253_v4 }
 0x2af   :  { %v2256_v28 = vpop.f32.mrf.mxu0 }
 0x2b0   :  { %v1831_v42 = vadd.f32 %v2255_v29, %v3032_v56 }
 0x2b1   :  { %v2257_v34 = vpop.f32.mrf.mxu0 }
 0x2b2   :  { %v2258_v39 = vadd.f32 %v2257_v34, %v2256_v28 }
 0x2b3   :  { %v3013_v45 = vpop.f32.mrf.mxu1 }
 0x2b4   :  { %v1834_v31 = vadd.f32 %v2258_v39, %v3032_v56 }
 0x2b5   :  { %v3015_v33 = vpop.f32.mrf.mxu1 }
 0x2b7   :  { %v3017_v55 = vpop.f32.mrf.mxu1 }
 0x2b9   :  { %v3019_v22 = vpop.f32.mrf.mxu1 }
 0x2bb   :  { %v3021_v49 = vpop.f32.mrf.mxu1 }
 0x2bd   :  { %v3023_v62 = vpop.f32.mrf.mxu1 }
 0x2bf   :  { %v3025_v3 = vpop.f32.mrf.mxu1 }
 0x2c1   :  { %v3027_v32 = vpop.f32.mrf.mxu1 }
 0x2cb   :  { %v2290_v23 = vpop.f32.mrf.mxu1 }
 0x2cc   :  { %v1896_v59 = vadd.f32 %v2290_v23, %v1799_v61  ;;  %v1826_v23 = vadd.f32 %v2252_v0, %v3032_v56 }
 0x2cd   :  { %v1887_v36 = vpop.f32.mrf.mxu1 }
 0x2ce   :  { %2455 = vtanh.f32 %v1896_v59  ;;  %v1888_v7 = vadd.f32 %v1887_v36, %v1791_v60  ;;  %v2267_v36 = vadd.f32 %v3023_v62, %v3021_v49 }
 0x2cf   :  { %v2291_v37 = vpop.f32.mrf.mxu1 }
 0x2d0   :  { %2457 = vtanh.f32 %v1888_v7  ;;  %v1899_v40 = vadd.f32 %v2291_v37, %v1802_v8  ;;  %v2261_v7 = vadd.f32 %v3015_v33, %v3013_v45  ;;  %v2270_v8 = vadd.f32 %v3027_v32, %v3025_v3 }
 0x2d1   :  { %v1890_v44 = vpop.f32.mrf.mxu1  ;;  %v1847_v35 = vadd.f32 %v2267_v36, %v3032_v56 }
 0x2d2   :  { %2459 = vtanh.f32 %v1899_v40  ;;  %v1891_v46 = vadd.f32 %v1890_v44, %v1794_v41  ;;  %v2264_v41 = vadd.f32 %v3019_v22, %v3017_v55  ;;  %v1850_v45 = vadd.f32 %v2270_v8, %v3032_v56 }
 0x2d4   :  { %2461 = vtanh.f32 %v1891_v46  ;;  %v1839_v46 = vadd.f32 %v2261_v7, %v3032_v56  ;;  %v1842_v32 = vadd.f32 %v2264_v41, %v3032_v56 }
 0x2db   :  { %v2456_v58 = vpop.eup %2455  ;;  %v2294_v5 = vpop.f32.mrf.mxu1 }
 0x2dc   :  { %1968 = vst [vmem:[#allocation7 + $0x10] sm:$0xff] %v2456_v58  ;;  %v1912_v9 = vadd.f32 %v2294_v5, %v1815_v27 }
 0x2dd   :  { %v2458_v11 = vpop.eup %2457  ;;  %v1903_v12 = vpop.f32.mrf.mxu1 }
 0x2de   :  { %1966 = vst [vmem:[#allocation7] sm:$0xff] %v2458_v11  ;;  %2463 = vtanh.f32 %v1912_v9  ;;  %v1904_v13 = vadd.f32 %v1903_v12, %v1807_v10 }
 0x2df   :  { %v2460_v15 = vpop.eup %2459  ;;  %v2295_v17 = vpop.f32.mrf.mxu1 }
 0x2e0   :  { %1969 = vst [vmem:[#allocation7 + $0x18] sm:$0xff] %v2460_v15  ;;  %2465 = vtanh.f32 %v1904_v13  ;;  %v1915_v18 = vadd.f32 %v2295_v17, %v1818_v14 }
 0x2e1   :  { %v2462_v20 = vpop.eup %2461  ;;  %v1906_v21 = vpop.f32.mrf.mxu1 }
 0x2e2   :  { %1967 = vst [vmem:[#allocation7 + $0x8] sm:$0xff] %v2462_v20  ;;  %2467 = vtanh.f32 %v1915_v18  ;;  %v1907_v24 = vadd.f32 %v1906_v21, %v1810_v19 }
 0x2e4   :  { %2469 = vtanh.f32 %v1907_v24 }
 0x2eb   :  { %v2464_v43 = vpop.eup %2463  ;;  %v2298_v48 = vpop.f32.mrf.mxu1 }
 0x2ec   :  { %1972 = vst [vmem:[#allocation7 + $0x30] sm:$0xff] %v2464_v43  ;;  %v1928_v50 = vadd.f32 %v2298_v48, %v1831_v42 }
 0x2ed   :  { %v2466_v2 = vpop.eup %2465  ;;  %v1919_v25 = vpop.f32.mrf.mxu1 }
 0x2ee   :  { %1970 = vst [vmem:[#allocation7 + $0x20] sm:$0xff] %v2466_v2  ;;  %2471 = vtanh.f32 %v1928_v50  ;;  %v1920_v26 = vadd.f32 %v1919_v25, %v1823_v63 }
 0x2ef   :  { %v2468_v57 = vpop.eup %2467  ;;  %v2299_v61 = vpop.f32.mrf.mxu1 }
 0x2f0   :  { %1973 = vst [vmem:[#allocation7 + $0x38] sm:$0xff] %v2468_v57  ;;  %2473 = vtanh.f32 %v1920_v26  ;;  %v1931_v1 = vadd.f32 %v2299_v61, %v1834_v31 }
 0x2f1   :  { %v2470_v30 = vpop.eup %2469  ;;  %v1922_v59 = vpop.f32.mrf.mxu1 }
 0x2f2   :  { %1971 = vst [vmem:[#allocation7 + $0x28] sm:$0xff] %v2470_v30  ;;  %2475 = vtanh.f32 %v1931_v1  ;;  %v1923_v60 = vadd.f32 %v1922_v59, %v1826_v23 }
 0x2f4   :  { %2477 = vtanh.f32 %v1923_v60 }
 0x2fb   :  { %v2472_v37 = vpop.eup %2471  ;;  %v2302_v40 = vpop.f32.mrf.mxu1 }
 0x2fc   :  { %1976 = vst [vmem:[#allocation7 + $0x50] sm:$0xff] %v2472_v37  ;;  %v1944_v44 = vadd.f32 %v2302_v40, %v1847_v35 }
 0x2fd   :  { %v2474_v47 = vpop.eup %2473  ;;  %v1935_v51 = vpop.f32.mrf.mxu1 }
 0x2fe   :  { %1974 = vst [vmem:[#allocation7 + $0x40] sm:$0xff] %v2474_v47  ;;  %2479 = vtanh.f32 %v1944_v44  ;;  %v1936_v49 = vadd.f32 %v1935_v51, %v1839_v46 }
 0x2ff   :  { %v2476_v33 = vpop.eup %2475  ;;  %v2303_v62 = vpop.f32.mrf.mxu1 }
 0x300   :  { %1977 = vst [vmem:[#allocation7 + $0x58] sm:$0xff] %v2476_v33  ;;  %2481 = vtanh.f32 %v1936_v49  ;;  %v1947_v3 = vadd.f32 %v2303_v62, %v1850_v45 }
 0x301   :  { %v2478_v52 = vpop.eup %2477  ;;  %v1938_v55 = vpop.f32.mrf.mxu1 }
 0x302   :  { %1975 = vst [vmem:[#allocation7 + $0x48] sm:$0xff] %v2478_v52  ;;  %2483 = vtanh.f32 %v1947_v3  ;;  %v1939_v22 = vadd.f32 %v1938_v55, %v1842_v32 }
 0x304   :  { %2485 = vtanh.f32 %v1939_v22 }
 0x30b   :  { %v2480_v53 = vpop.eup %2479 }
 0x30c   :  { %1980 = vst [vmem:[#allocation7 + $0x70] sm:$0xff] %v2480_v53 }
 0x30d   :  { %v2482_v54 = vpop.eup %2481 }
 0x30e   :  { %1978 = vst [vmem:[#allocation7 + $0x60] sm:$0xff] %v2482_v54 }
 0x30f   :  { %v2484_v27 = vpop.eup %2483 }
 0x310   :  { %1981 = vst [vmem:[#allocation7 + $0x78] sm:$0xff] %v2484_v27 }
 0x311   :  { %v2486_v58 = vpop.eup %2485 }
 0x312   :  { %1979 = vst [vmem:[#allocation7 + $0x68] sm:$0xff] %v2486_v58 }
 0x313   :  { %2538 = shalt.err (!%p2535_p0)
}
 0x314   :  { %s2562_s27 = smov 128   ;;  %s2563_s28 = smov 8  }
 0x315   :  { %1993 = dma.vmem_to_hbm [thread:$0]  %s1988_s25, 2048, %s3068_s7, [#allocation4], %s2562_s27, %s2562_s27, %s2563_s28  }
 0x316   :  { %2551 = dma.done.wait [#allocation4], 2048  }
 0x317   :  { %2552 = vsyncadd [#allocation4], 4294965248 }
 0x318   :  { %1997 = vsyncpa [#allocation3], 1 }
 0x319   :  { %1998 = vsyncpa [#allocation6], 1 }
 0x31a   :  { %1999 = vsyncpa [#allocation4], 1 }

</bundles_post_ra>
